<compile_context>
chip_gen: v7x
topology: tpu7x:2x2x1
jax: 0.10.0
libtpu: 0.0.40
codegen_flags: <defaults>
</compile_context>

<pallas_src>
import math
import jax
import jax.numpy as jnp
from jax import lax
from jax.experimental import pallas as pl
from jax.experimental.pallas import tpu as pltpu


# ----------------------------------------------------------------------------
# Fused kernel: attention softmax -> (scale @ W_attn) @ V reduction (h0) ->
#               LSTMCell decode loop (collapsed matmul for t>=1) ->
#               out projection -> softmax -> single full-block stores.
# ----------------------------------------------------------------------------
def fused_operator_kernel(q_ref, kt_ref, v_ref, scale_ref, b_in_ref,
                          w_ih_ref, w_hh_ref, w_sum_ref, b_g_ref, start_ref,
                          w_o_ref, b_o_ref,
                          attnw_ref, latents_ref, logits_ref):
    B, Sq, H = q_ref.shape
    T = latents_ref.shape[1]
    Opp = logits_ref.shape[2]

    # ---- attention weights: softmax(Q @ K^T, dim=-1), whole batch at once ----
    s = lax.dot_general(q_ref[...], kt_ref[...], (((2,), (1,)), ((0,), (0,))),
                        preferred_element_type=jnp.float32)           # (B,Sq,Sf)
    s_max = jnp.max(s, axis=-1, keepdims=True)
    e = jnp.exp(s - s_max)
    inv_den = pl.reciprocal(jnp.sum(e, axis=-1, keepdims=True), approx=True)
    w = e * inv_den                                                    # f32
    attnw_ref[...] = w.astype(attnw_ref.dtype)

    # ---- h0 = (scale_row @ W_attn) @ V + b_in --------------------------------
    # scale_ref holds [0, min_d[:,1:] * in_proj_w] so no [:,1:,:] slice and the
    # full (B,Sq,H) attention output is never materialized.
    scale = scale_ref[...]                                             # (B,Sq) f32
    wv = lax.dot_general(scale[:, None, :], w, (((2,), (1,)), ((0,), (0,))),
                         preferred_element_type=jnp.float32)           # (B,1,Sf)
    v = v_ref[...]                                                     # (B,Sf,H) bf16
    h = lax.dot_general(wv.astype(v.dtype), v, (((2,), (1,)), ((0,), (0,))),
                        preferred_element_type=jnp.float32)[:, 0, :]   # (B,H)
    h = h + b_in_ref[...]
    c = jnp.zeros_like(h)

    w_ih = w_ih_ref[...]            # (H,4H) bf16  -- only used for t == 0
    w_hh = w_hh_ref[...]            # (H,4H) bf16  -- only used for t == 0
    w_sum = w_sum_ref[...]          # (H,4H) bf16  -- W_ih + W_hh, for t >= 1
    w_o = w_o_ref[...]              # (H,Opp) bf16
    # Hoisted bias broadcasts (JAX doesn't CSE broadcast_in_dim in the unroll).
    b_g_b = jnp.broadcast_to(b_g_ref[...], (B, 4 * H))                 # f32
    b_o_b = jnp.broadcast_to(b_o_ref[...], (B, Opp))                   # f32 (-1e30 pad)
    # Start-token gate contribution: batch-invariant (1,4H), computed once.
    g_start = lax.dot_general(start_ref[...], w_ih, (((1,), (0,)), ((), ())),
                              preferred_element_type=jnp.float32)      # (1,4H)

    hs = []
    probs = []
    # operator_length is small & static -> unrolled.
    for t in range(T):
        if t == 0:
            gates = (g_start
                     + lax.dot_general(h.astype(w_hh.dtype), w_hh,
                                       (((1,), (0,)), ((), ())),
                                       preferred_element_type=jnp.float32)
                     + b_g_b)                                          # (B,4H)
        else:
            # Inference branch: x_t = attention(x, h, h) with a single key ->
            # softmax == 1 -> x_t == h_{t-1}, so the two matmuls collapse into
            # one against the pre-summed weight.
            gates = (lax.dot_general(h.astype(w_sum.dtype), w_sum,
                                     (((1,), (0,)), ((), ())),
                                     preferred_element_type=jnp.float32)
                     + b_g_b)                                          # (B,4H)
        i_g = jax.nn.sigmoid(gates[:, 0:H])
        f_g = jax.nn.sigmoid(gates[:, H:2 * H])
        g_g = jnp.tanh(gates[:, 2 * H:3 * H])
        o_g = jax.nn.sigmoid(gates[:, 3 * H:4 * H])
        c = f_g * c + i_g * g_g
        h = o_g * jnp.tanh(c)
        hs.append(h)

        # out_prj + softmax over the (padded, lane-dense) operator axis.
        sc = lax.dot_general(h.astype(w_o.dtype), w_o, (((1,), (0,)), ((), ())),
                             preferred_element_type=jnp.float32) + b_o_b
        m = jnp.max(sc, axis=-1, keepdims=True)
        ee = jnp.exp(sc - m)
        inv2 = pl.reciprocal(jnp.sum(ee, axis=-1, keepdims=True), approx=True)
        probs.append(ee * inv2)
        # TODO(synk): training-mode teacher forcing (host random.uniform) and
        # dropout are not kernelized; only the eval path is implemented.

    # One full-block store per output instead of 2*T masked partial stores.
    latents_ref[...] = jnp.concatenate([hh[:, None, :] for hh in hs],
                                       axis=1).astype(latents_ref.dtype)
    logits_ref[...] = jnp.concatenate([pp[:, None, :] for pp in probs],
                                      axis=1).astype(logits_ref.dtype)


def fused_operator_pallas(q, kT, v, scale_full, b_in_row, w_ihT, w_hhT, w_sumT,
                          b_gates, start, w_outT_pad, b_out_pad, operator_length):
    B, Sq, H = q.shape
    Sf = kT.shape[2]
    Opp = w_outT_pad.shape[1]
    T = operator_length
    return pl.pallas_call(
        fused_operator_kernel,
        out_shape=(jax.ShapeDtypeStruct((B, Sq, Sf), jnp.float32),   # attention weights
                   jax.ShapeDtypeStruct((B, T, H), jnp.float32),     # latents
                   jax.ShapeDtypeStruct((B, T, Opp), jnp.float32)),  # softmax probs (padded Op)
        grid=(1,),
        in_specs=[
            pl.BlockSpec((B, Sq, H), lambda i: (0, 0, 0)),   # Q + PE, bf16
            pl.BlockSpec((B, H, Sf), lambda i: (0, 0, 0)),   # K^T, bf16
            pl.BlockSpec((B, Sf, H), lambda i: (0, 0, 0)),   # V, bf16
            pl.BlockSpec((B, Sq), lambda i: (0, 0)),         # [0, min_d*in_proj_w] f32
            pl.BlockSpec((1, H), lambda i: (0, 0)),          # in_proj bias row, f32
            pl.BlockSpec((H, 4 * H), lambda i: (0, 0)),      # W_ih^T, bf16 (t=0)
            pl.BlockSpec((H, 4 * H), lambda i: (0, 0)),      # W_hh^T, bf16 (t=0)
            pl.BlockSpec((H, 4 * H), lambda i: (0, 0)),      # (W_ih+W_hh)^T, bf16 (t>=1)
            pl.BlockSpec((1, 4 * H), lambda i: (0, 0)),      # b_ih + b_hh, f32
            pl.BlockSpec((1, H), lambda i: (0, 0)),          # start token, bf16
            pl.BlockSpec((H, Opp), lambda i: (0, 0)),        # out_prj W^T (padded), bf16
            pl.BlockSpec((1, Opp), lambda i: (0, 0)),        # out_prj b (padded -1e30), f32
        ],
        out_specs=(
            pl.BlockSpec((B, Sq, Sf), lambda i: (0, 0, 0)),
            pl.BlockSpec((B, T, H), lambda i: (0, 0, 0)),
            pl.BlockSpec((B, T, Opp), lambda i: (0, 0, 0)),
        ),
        # NOTE for real shapes (Sq=Sf=512, bigger B): tile Sq via a grid axis,
        # raise vmem_limit_bytes (v7x: 64 MiB physical / 32 MiB scoped; v5e:
        # 16 MiB scoped), and on v7x add a "parallel" batch axis for the 2 TCs.
        compiler_params=pltpu.CompilerParams(dimension_semantics=("arbitrary",)),
    )(q, kT, v, scale_full, b_in_row, w_ihT, w_hhT, w_sumT, b_gates, start,
      w_outT_pad, b_out_pad)


# ----------------------------------------------------------------------------
# Plain-JAX glue
# ----------------------------------------------------------------------------
def positional_encoding_table(max_len, d_model):
    position = jnp.arange(max_len, dtype=jnp.float32)[:, None]
    div_term = jnp.exp(jnp.arange(0, d_model, 2, dtype=jnp.float32)
                       * (-math.log(10000.0) / d_model))
    pe = jnp.zeros((max_len, d_model), jnp.float32)
    pe = pe.at[:, 0::2].set(jnp.sin(position * div_term))
    pe = pe.at[:, 1::2].set(jnp.cos(position * div_term))
    return pe  # (max_len, d_model)


def init_params(key, hidden_size, operator_list_size, input_len):
    H, Op = hidden_size, operator_list_size
    ks = jax.random.split(key, 9)
    s = 0.1
    params = {
        # "BERT-summed" operator vocab (1, Op, H) — synthetic, deterministic.
        "operator_vocab": jax.random.normal(ks[0], (1, Op, H), jnp.float32),
        # OperatorRNN.in_proj : Linear(input_len, 1)
        "in_proj_w": s * jax.random.normal(ks[1], (1, input_len), jnp.float32),
        "in_proj_b": s * jax.random.normal(ks[2], (1,), jnp.float32),
        # LSTMCell(H, H)
        "w_ih": s * jax.random.normal(ks[3], (4 * H, H), jnp.float32),
        "w_hh": s * jax.random.normal(ks[4], (4 * H, H), jnp.float32),
        "b_ih": s * jax.random.normal(ks[5], (4 * H,), jnp.float32),
        "b_hh": s * jax.random.normal(ks[6], (4 * H,), jnp.float32),
        # OperatorRNN.out_prj : Linear(H, Op)
        "out_w": s * jax.random.normal(ks[7], (Op, H), jnp.float32),
        "out_b": s * jax.random.normal(ks[8], (Op,), jnp.float32),
    }
    return params


def operator_model_forward(params, question_encoded, facts_encoded, distances,
                           program_ids, program_mask, operator_ids, operator_mask,
                           operator_length, hidden_size):
    B, Sq, H = question_encoded.shape
    Sf = facts_encoded.shape[1]
    op_vocab = params["operator_vocab"]                 # (1, Op, H)
    Op = op_vocab.shape[1]

    # operator_encoded: gather vocab rows by operator_ids
    operator_encoded = op_vocab[0][operator_ids]        # (B, T, H)

    # PositionalEncoding (dropout=0 -> identity); cast MXU operands to bf16 and
    # pre-transpose K so the score matmul is a canonical contraction.
    pe = positional_encoding_table(max(Sq, Sf), H)
    q = (question_encoded + pe[:Sq][None, :, :]).astype(jnp.bfloat16)
    kv = facts_encoded + pe[:Sf][None, :, :]
    kT = jnp.transpose(kv, (0, 2, 1)).astype(jnp.bfloat16)      # (B, H, Sf)
    v = kv.astype(jnp.bfloat16)

    # Fold min(distances, dim=2)[:, 1:] with the in_proj weight into one scale
    # row, padded with a leading zero so the kernel contracts over the full Sq
    # axis (no in-kernel [:,1:,:] slice, exact same result).
    min_d = jnp.min(distances, axis=2)                           # (B, Sq)
    scale_full = jnp.concatenate(
        [jnp.zeros((B, 1), jnp.float32),
         min_d[:, 1:] * params["in_proj_w"][0][None, :]], axis=1)  # (B, Sq)

    b_in_row = jnp.full((1, H), params["in_proj_b"][0], jnp.float32)
    b_gates = (params["b_ih"] + params["b_hh"]).reshape(1, 4 * H)
    start = op_vocab[:, 2, :].astype(jnp.bfloat16)               # (1, H)

    # LSTM weights: per-step form (t=0) and pre-summed form (t>=1, x == h).
    # Sum in f32, then cast once to bf16.
    w_ihT = params["w_ih"].T.astype(jnp.bfloat16)                # (H, 4H)
    w_hhT = params["w_hh"].T.astype(jnp.bfloat16)                # (H, 4H)
    w_sumT = (params["w_ih"] + params["w_hh"]).T.astype(jnp.bfloat16)

    # Pad operator dim to a lane-dense multiple of 128; padded lanes get a -1e30
    # bias (kept f32) so the in-kernel softmax over the padded axis is exact.
    Opp = ((Op + 127) // 128) * 128
    w_outT_pad = jnp.zeros((H, Opp), jnp.float32).at[:, :Op].set(
        params["out_w"].T).astype(jnp.bfloat16)
    b_out_pad = jnp.full((1, Opp), -1e30, jnp.float32).at[0, :Op].set(
        params["out_b"])

    qf_weights, latents, logits_pad = fused_operator_pallas(
        q, kT, v, scale_full, b_in_row, w_ihT, w_hhT, w_sumT,
        b_gates, start, w_outT_pad, b_out_pad, operator_length)

    logits = logits_pad[:, :, :Op]                               # (B, T, Op)

    operator_indices = jnp.arange(operator_length) * 4
    operator_golds = program_ids[:, operator_indices]
    operator_preds = jnp.argmax(logits, axis=2)

    # NB: "operator_logits" is a softmax distribution, matching the original
    # module (F.softmax(out_prj(...), dim=2)).
    return {
        "operator_latents": latents,
        "operator_encoded": operator_encoded,
        "operator_logits": logits,
        "operator_preds": operator_preds,
        "operator_golds": operator_golds,
        "operator_mask": operator_mask.astype(jnp.int32),
        "operator_weights": qf_weights,
        "program_ids": program_ids,
        "program_mask": program_mask,
    }


# ----------------------------------------------------------------------------
if __name__ == "__main__":
    B = 2
    Sq = 8           # question seq len
    Sf = 8           # facts seq len
    H = 32           # hidden_size
    OP = 10          # operator_list_size
    T = 4            # operator_length
    KD = 6           # distances last dim
    PROG = 16        # program seq len (>= 4*T - 3)
    INPUT_LEN = Sq - 1

    key = jax.random.PRNGKey(0)
    k_par, k_q, k_f, k_d, k_pid, k_oid = jax.random.split(key, 6)

    params = init_params(k_par, H, OP, INPUT_LEN)

    question_encoded = jax.random.normal(k_q, (B, Sq, H), jnp.float32)
    facts_encoded = jax.random.normal(k_f, (B, Sf, H), jnp.float32)
    distances = jax.random.uniform(k_d, (B, Sq, KD), jnp.float32)
    program_ids = jax.random.randint(k_pid, (B, PROG), 0, 100, jnp.int32)
    program_mask = jnp.ones((B, PROG), jnp.int32)
    operator_ids = jax.random.randint(k_oid, (B, T), 0, OP, jnp.int32)
    operator_mask = jnp.ones((B, T), jnp.float32)

    out = operator_model_forward(params, question_encoded, facts_encoded,
                                 distances, program_ids, program_mask,
                                 operator_ids, operator_mask, T, H)
    jax.block_until_ready(out)

    assert out["operator_logits"].shape == (B, T, OP)
    assert out["operator_latents"].shape == (B, T, H)
    assert out["operator_weights"].shape == (B, Sq, Sf)
    assert out["operator_preds"].shape == (B, T)
    assert out["operator_golds"].shape == (B, T)
    # softmax rows should sum to ~1 (padded operator lanes contribute 0)
    assert bool(jnp.all(jnp.abs(jnp.sum(out["operator_logits"], axis=-1) - 1.0) < 1e-2))
    # attention-weight rows should sum to ~1
    assert bool(jnp.all(jnp.abs(jnp.sum(out["operator_weights"], axis=-1) - 1.0) < 1e-2))
    print("KERNEL_OK")
</pallas_src>

<mosaic_0001>
module attributes {stable_mosaic.version = 11 : i64} {
  func.func @fused_operator_kernel(%arg0: i32, %arg1: memref<2x8x32xbf16, #tpu.memory_space<vmem>>, %arg2: memref<2x32x8xbf16, #tpu.memory_space<vmem>>, %arg3: memref<2x8x32xbf16, #tpu.memory_space<vmem>>, %arg4: memref<2x8xf32, #tpu.memory_space<vmem>>, %arg5: memref<1x32xf32, #tpu.memory_space<vmem>>, %arg6: memref<32x128xbf16, #tpu.memory_space<vmem>>, %arg7: memref<32x128xbf16, #tpu.memory_space<vmem>>, %arg8: memref<32x128xbf16, #tpu.memory_space<vmem>>, %arg9: memref<1x128xf32, #tpu.memory_space<vmem>>, %arg10: memref<1x32xbf16, #tpu.memory_space<vmem>>, %arg11: memref<32x128xbf16, #tpu.memory_space<vmem>>, %arg12: memref<1x128xf32, #tpu.memory_space<vmem>>, %arg13: memref<2x8x8xf32, #tpu.memory_space<vmem>>, %arg14: memref<2x4x32xf32, #tpu.memory_space<vmem>>, %arg15: memref<2x4x128xf32, #tpu.memory_space<vmem>>) attributes {dimension_semantics = [#tpu.dimension_semantics<arbitrary>], iteration_bounds = array<i64: 1>, scalar_prefetch = 0 : i64, scratch_operands = 0 : i64, tpu.core_type = #tpu.core_type<tc>, window_params = [{pipeline_mode = #tpu.pipeline_mode<synchronous>, transform_indices = @transform_0, window_bounds = array<i64: 2, 8, 32>}, {pipeline_mode = #tpu.pipeline_mode<synchronous>, transform_indices = @transform_1, window_bounds = array<i64: 2, 32, 8>}, {pipeline_mode = #tpu.pipeline_mode<synchronous>, transform_indices = @transform_2, window_bounds = array<i64: 2, 8, 32>}, {pipeline_mode = #tpu.pipeline_mode<synchronous>, transform_indices = @transform_3, window_bounds = array<i64: 2, 8>}, {pipeline_mode = #tpu.pipeline_mode<synchronous>, transform_indices = @transform_4, window_bounds = array<i64: 1, 32>}, {pipeline_mode = #tpu.pipeline_mode<synchronous>, transform_indices = @transform_5, window_bounds = array<i64: 32, 128>}, {pipeline_mode = #tpu.pipeline_mode<synchronous>, transform_indices = @transform_6, window_bounds = array<i64: 32, 128>}, {pipeline_mode = #tpu.pipeline_mode<synchronous>, transform_indices = @transform_7, window_bounds = array<i64: 32, 128>}, {pipeline_mode = #tpu.pipeline_mode<synchronous>, transform_indices = @transform_8, window_bounds = array<i64: 1, 128>}, {pipeline_mode = #tpu.pipeline_mode<synchronous>, transform_indices = @transform_9, window_bounds = array<i64: 1, 32>}, {pipeline_mode = #tpu.pipeline_mode<synchronous>, transform_indices = @transform_10, window_bounds = array<i64: 32, 128>}, {pipeline_mode = #tpu.pipeline_mode<synchronous>, transform_indices = @transform_11, window_bounds = array<i64: 1, 128>}, {pipeline_mode = #tpu.pipeline_mode<synchronous>, transform_indices = @transform_12, window_bounds = array<i64: 2, 8, 8>}, {pipeline_mode = #tpu.pipeline_mode<synchronous>, transform_indices = @transform_13, window_bounds = array<i64: 2, 4, 32>}, {pipeline_mode = #tpu.pipeline_mode<synchronous>, transform_indices = @transform_14, window_bounds = array<i64: 2, 4, 128>}]} {
    %c0 = arith.constant 0 : index
    %c0_0 = arith.constant 0 : index
    %c0_1 = arith.constant 0 : index
    %0 = vector.load %arg1[%c0, %c0_0, %c0_1] : memref<2x8x32xbf16, #tpu.memory_space<vmem>>, vector<2x8x32xbf16>
    %c0_2 = arith.constant 0 : index
    %c0_3 = arith.constant 0 : index
    %c0_4 = arith.constant 0 : index
    %1 = vector.load %arg2[%c0_2, %c0_3, %c0_4] : memref<2x32x8xbf16, #tpu.memory_space<vmem>>, vector<2x32x8xbf16>
    %cst = arith.constant dense<0.000000e+00> : vector<2x8x8xf32>
    %2 = tpu.matmul %0, %1, %cst {dimension_numbers = #tpu.dot_dimension_numbers<[2], [1], [1], [2], [0, 0, 0, 1, 1, 2], [0], [0]>} : vector<2x8x32xbf16>, vector<2x32x8xbf16>, vector<2x8x8xf32> -> vector<2x8x8xf32>
    %cst_5 = arith.constant dense<0xFF800000> : vector<2x8xf32>
    %3 = vector.multi_reduction <maximumf>, %2, %cst_5 [2] : vector<2x8x8xf32> to vector<2x8xf32>
    %4 = vector.shape_cast %3 : vector<2x8xf32> to vector<2x8x1xf32>
    %5 = vector.broadcast %4 : vector<2x8x1xf32> to vector<2x8x8xf32>
    %6 = arith.subf %2, %5 : vector<2x8x8xf32>
    %7 = math.exp %6 : vector<2x8x8xf32>
    %cst_6 = arith.constant dense<0.000000e+00> : vector<2x8xf32>
    %8 = vector.multi_reduction <add>, %7, %cst_6 [2] : vector<2x8x8xf32> to vector<2x8xf32>
    %9 = vector.shape_cast %8 : vector<2x8xf32> to vector<2x8x1xf32>
    %10 = tpu.reciprocal %9 {approx = true} : vector<2x8x1xf32> -> vector<2x8x1xf32>
    %11 = vector.broadcast %10 : vector<2x8x1xf32> to vector<2x8x8xf32>
    %12 = arith.mulf %7, %11 : vector<2x8x8xf32>
    %c0_7 = arith.constant 0 : index
    %c0_8 = arith.constant 0 : index
    %c0_9 = arith.constant 0 : index
    %13 = vector.load %arg13[%c0_7, %c0_8, %c0_9] : memref<2x8x8xf32, #tpu.memory_space<vmem>>, vector<2x8x8xf32>
    tpu.vector_store %arg13[%c0_7, %c0_8, %c0_9], %12 {strides = array<i32>} : memref<2x8x8xf32, #tpu.memory_space<vmem>>, vector<2x8x8xf32>,
    %c0_10 = arith.constant 0 : index
    %c0_11 = arith.constant 0 : index
    %14 = vector.load %arg4[%c0_10, %c0_11] : memref<2x8xf32, #tpu.memory_space<vmem>>, vector<2x8xf32>
    %15 = vector.shape_cast %14 : vector<2x8xf32> to vector<2x1x8xf32>
    %cst_12 = arith.constant dense<0.000000e+00> : vector<2x1x8xf32>
    %16 = tpu.matmul %15, %12, %cst_12 {dimension_numbers = #tpu.dot_dimension_numbers<[2], [1], [1], [2], [0, 0, 0, 1, 1, 2], [0], [0]>} : vector<2x1x8xf32>, vector<2x8x8xf32>, vector<2x1x8xf32> -> vector<2x1x8xf32>
    %c0_13 = arith.constant 0 : index
    %c0_14 = arith.constant 0 : index
    %c0_15 = arith.constant 0 : index
    %17 = vector.load %arg3[%c0_13, %c0_14, %c0_15] : memref<2x8x32xbf16, #tpu.memory_space<vmem>>, vector<2x8x32xbf16>
    %18 = arith.truncf %16 : vector<2x1x8xf32> to vector<2x1x8xbf16>
    %cst_16 = arith.constant dense<0.000000e+00> : vector<2x1x32xf32>
    %19 = tpu.matmul %18, %17, %cst_16 {dimension_numbers = #tpu.dot_dimension_numbers<[2], [1], [1], [2], [0, 0, 0, 1, 1, 2], [0], [0]>} : vector<2x1x8xbf16>, vector<2x8x32xbf16>, vector<2x1x32xf32> -> vector<2x1x32xf32>
    %20 = vector.shape_cast %19 : vector<2x1x32xf32> to vector<2x32xf32>
    %c0_17 = arith.constant 0 : index
    %c0_18 = arith.constant 0 : index
    %21 = vector.load %arg5[%c0_17, %c0_18] : memref<1x32xf32, #tpu.memory_space<vmem>>, vector<1x32xf32>
    %22 = vector.broadcast %21 : vector<1x32xf32> to vector<2x32xf32>
    %23 = arith.addf %20, %22 : vector<2x32xf32>
    %cst_19 = arith.constant 0.000000e+00 : f32
    %24 = vector.broadcast %cst_19 : f32 to vector<2x32xf32>
    %c0_20 = arith.constant 0 : index
    %c0_21 = arith.constant 0 : index
    %25 = vector.load %arg6[%c0_20, %c0_21] : memref<32x128xbf16, #tpu.memory_space<vmem>>, vector<32x128xbf16>
    %c0_22 = arith.constant 0 : index
    %c0_23 = arith.constant 0 : index
    %26 = vector.load %arg7[%c0_22, %c0_23] : memref<32x128xbf16, #tpu.memory_space<vmem>>, vector<32x128xbf16>
    %c0_24 = arith.constant 0 : index
    %c0_25 = arith.constant 0 : index
    %27 = vector.load %arg8[%c0_24, %c0_25] : memref<32x128xbf16, #tpu.memory_space<vmem>>, vector<32x128xbf16>
    %c0_26 = arith.constant 0 : index
    %c0_27 = arith.constant 0 : index
    %28 = vector.load %arg11[%c0_26, %c0_27] : memref<32x128xbf16, #tpu.memory_space<vmem>>, vector<32x128xbf16>
    %c0_28 = arith.constant 0 : index
    %c0_29 = arith.constant 0 : index
    %29 = vector.load %arg9[%c0_28, %c0_29] : memref<1x128xf32, #tpu.memory_space<vmem>>, vector<1x128xf32>
    %30 = vector.shape_cast %29 : vector<1x128xf32> to vector<1x128xf32>
    %31 = vector.broadcast %30 : vector<1x128xf32> to vector<2x128xf32>
    %c0_30 = arith.constant 0 : index
    %c0_31 = arith.constant 0 : index
    %32 = vector.load %arg12[%c0_30, %c0_31] : memref<1x128xf32, #tpu.memory_space<vmem>>, vector<1x128xf32>
    %33 = vector.shape_cast %32 : vector<1x128xf32> to vector<1x128xf32>
    %34 = vector.broadcast %33 : vector<1x128xf32> to vector<2x128xf32>
    %c0_32 = arith.constant 0 : index
    %c0_33 = arith.constant 0 : index
    %35 = vector.load %arg10[%c0_32, %c0_33] : memref<1x32xbf16, #tpu.memory_space<vmem>>, vector<1x32xbf16>
    %cst_34 = arith.constant dense<0.000000e+00> : vector<1x128xf32>
    %36 = tpu.matmul %35, %25, %cst_34 {dimension_numbers = #tpu.dot_dimension_numbers<[1], [0], [0], [1], [0, 0, 1, 1], [], []>} : vector<1x32xbf16>, vector<32x128xbf16>, vector<1x128xf32> -> vector<1x128xf32>
    %37 = arith.truncf %23 : vector<2x32xf32> to vector<2x32xbf16>
    %cst_35 = arith.constant dense<0.000000e+00> : vector<2x128xf32>
    %38 = tpu.matmul %37, %26, %cst_35 {dimension_numbers = #tpu.dot_dimension_numbers<[1], [0], [0], [1], [0, 0, 1, 1], [], []>} : vector<2x32xbf16>, vector<32x128xbf16>, vector<2x128xf32> -> vector<2x128xf32>
    %39 = vector.broadcast %36 : vector<1x128xf32> to vector<2x128xf32>
    %40 = arith.addf %39, %38 : vector<2x128xf32>
    %41 = arith.addf %40, %31 : vector<2x128xf32>
    %42 = vector.extract_strided_slice %41 {offsets = [0, 0], sizes = [2, 32], strides = [1, 1]} : vector<2x128xf32> to vector<2x32xf32>
    %43 = arith.negf %42 : vector<2x32xf32>
    %44 = math.exp %43 : vector<2x32xf32>
    %cst_36 = arith.constant 1.000000e+00 : f32
    %45 = vector.broadcast %cst_36 : f32 to vector<2x32xf32>
    %46 = arith.addf %45, %44 : vector<2x32xf32>
    %47 = arith.divf %45, %46 : vector<2x32xf32>
    %48 = vector.extract_strided_slice %41 {offsets = [0, 32], sizes = [2, 32], strides = [1, 1]} : vector<2x128xf32> to vector<2x32xf32>
    %49 = arith.negf %48 : vector<2x32xf32>
    %50 = math.exp %49 : vector<2x32xf32>
    %cst_37 = arith.constant 1.000000e+00 : f32
    %51 = vector.broadcast %cst_37 : f32 to vector<2x32xf32>
    %52 = arith.addf %51, %50 : vector<2x32xf32>
    %53 = arith.divf %51, %52 : vector<2x32xf32>
    %54 = vector.extract_strided_slice %41 {offsets = [0, 64], sizes = [2, 32], strides = [1, 1]} : vector<2x128xf32> to vector<2x32xf32>
    %55 = math.tanh %54 : vector<2x32xf32>
    %56 = vector.extract_strided_slice %41 {offsets = [0, 96], sizes = [2, 32], strides = [1, 1]} : vector<2x128xf32> to vector<2x32xf32>
    %57 = arith.negf %56 : vector<2x32xf32>
    %58 = math.exp %57 : vector<2x32xf32>
    %cst_38 = arith.constant 1.000000e+00 : f32
    %59 = vector.broadcast %cst_38 : f32 to vector<2x32xf32>
    %60 = arith.addf %59, %58 : vector<2x32xf32>
    %61 = arith.divf %59, %60 : vector<2x32xf32>
    %62 = arith.mulf %53, %24 : vector<2x32xf32>
    %63 = arith.mulf %47, %55 : vector<2x32xf32>
    %64 = arith.addf %62, %63 : vector<2x32xf32>
    %65 = math.tanh %64 : vector<2x32xf32>
    %66 = arith.mulf %61, %65 : vector<2x32xf32>
    %67 = arith.truncf %66 : vector<2x32xf32> to vector<2x32xbf16>
    %cst_39 = arith.constant dense<0.000000e+00> : vector<2x128xf32>
    %68 = tpu.matmul %67, %28, %cst_39 {dimension_numbers = #tpu.dot_dimension_numbers<[1], [0], [0], [1], [0, 0, 1, 1], [], []>} : vector<2x32xbf16>, vector<32x128xbf16>, vector<2x128xf32> -> vector<2x128xf32>
    %69 = arith.addf %68, %34 : vector<2x128xf32>
    %cst_40 = arith.constant dense<0xFF800000> : vector<2xf32>
    %70 = vector.multi_reduction <maximumf>, %69, %cst_40 [1] : vector<2x128xf32> to vector<2xf32>
    %71 = vector.shape_cast %70 : vector<2xf32> to vector<2x1xf32>
    %72 = vector.broadcast %71 : vector<2x1xf32> to vector<2x128xf32>
    %73 = arith.subf %69, %72 : vector<2x128xf32>
    %74 = math.exp %73 : vector<2x128xf32>
    %cst_41 = arith.constant dense<0.000000e+00> : vector<2xf32>
    %75 = vector.multi_reduction <add>, %74, %cst_41 [1] : vector<2x128xf32> to vector<2xf32>
    %76 = vector.shape_cast %75 : vector<2xf32> to vector<2x1xf32>
    %77 = tpu.reciprocal %76 {approx = true} : vector<2x1xf32> -> vector<2x1xf32>
    %78 = vector.broadcast %77 : vector<2x1xf32> to vector<2x128xf32>
    %79 = arith.mulf %74, %78 : vector<2x128xf32>
    %80 = arith.truncf %66 : vector<2x32xf32> to vector<2x32xbf16>
    %cst_42 = arith.constant dense<0.000000e+00> : vector<2x128xf32>
    %81 = tpu.matmul %80, %27, %cst_42 {dimension_numbers = #tpu.dot_dimension_numbers<[1], [0], [0], [1], [0, 0, 1, 1], [], []>} : vector<2x32xbf16>, vector<32x128xbf16>, vector<2x128xf32> -> vector<2x128xf32>
    %82 = arith.addf %81, %31 : vector<2x128xf32>
    %83 = vector.extract_strided_slice %82 {offsets = [0, 0], sizes = [2, 32], strides = [1, 1]} : vector<2x128xf32> to vector<2x32xf32>
    %84 = arith.negf %83 : vector<2x32xf32>
    %85 = math.exp %84 : vector<2x32xf32>
    %cst_43 = arith.constant 1.000000e+00 : f32
    %86 = vector.broadcast %cst_43 : f32 to vector<2x32xf32>
    %87 = arith.addf %86, %85 : vector<2x32xf32>
    %88 = arith.divf %86, %87 : vector<2x32xf32>
    %89 = vector.extract_strided_slice %82 {offsets = [0, 32], sizes = [2, 32], strides = [1, 1]} : vector<2x128xf32> to vector<2x32xf32>
    %90 = arith.negf %89 : vector<2x32xf32>
    %91 = math.exp %90 : vector<2x32xf32>
    %cst_44 = arith.constant 1.000000e+00 : f32
    %92 = vector.broadcast %cst_44 : f32 to vector<2x32xf32>
    %93 = arith.addf %92, %91 : vector<2x32xf32>
    %94 = arith.divf %92, %93 : vector<2x32xf32>
    %95 = vector.extract_strided_slice %82 {offsets = [0, 64], sizes = [2, 32], strides = [1, 1]} : vector<2x128xf32> to vector<2x32xf32>
    %96 = math.tanh %95 : vector<2x32xf32>
    %97 = vector.extract_strided_slice %82 {offsets = [0, 96], sizes = [2, 32], strides = [1, 1]} : vector<2x128xf32> to vector<2x32xf32>
    %98 = arith.negf %97 : vector<2x32xf32>
    %99 = math.exp %98 : vector<2x32xf32>
    %cst_45 = arith.constant 1.000000e+00 : f32
    %100 = vector.broadcast %cst_45 : f32 to vector<2x32xf32>
    %101 = arith.addf %100, %99 : vector<2x32xf32>
    %102 = arith.divf %100, %101 : vector<2x32xf32>
    %103 = arith.mulf %94, %64 : vector<2x32xf32>
    %104 = arith.mulf %88, %96 : vector<2x32xf32>
    %105 = arith.addf %103, %104 : vector<2x32xf32>
    %106 = math.tanh %105 : vector<2x32xf32>
    %107 = arith.mulf %102, %106 : vector<2x32xf32>
    %108 = arith.truncf %107 : vector<2x32xf32> to vector<2x32xbf16>
    %cst_46 = arith.constant dense<0.000000e+00> : vector<2x128xf32>
    %109 = tpu.matmul %108, %28, %cst_46 {dimension_numbers = #tpu.dot_dimension_numbers<[1], [0], [0], [1], [0, 0, 1, 1], [], []>} : vector<2x32xbf16>, vector<32x128xbf16>, vector<2x128xf32> -> vector<2x128xf32>
    %110 = arith.addf %109, %34 : vector<2x128xf32>
    %cst_47 = arith.constant dense<0xFF800000> : vector<2xf32>
    %111 = vector.multi_reduction <maximumf>, %110, %cst_47 [1] : vector<2x128xf32> to vector<2xf32>
    %112 = vector.shape_cast %111 : vector<2xf32> to vector<2x1xf32>
    %113 = vector.broadcast %112 : vector<2x1xf32> to vector<2x128xf32>
    %114 = arith.subf %110, %113 : vector<2x128xf32>
    %115 = math.exp %114 : vector<2x128xf32>
    %cst_48 = arith.constant dense<0.000000e+00> : vector<2xf32>
    %116 = vector.multi_reduction <add>, %115, %cst_48 [1] : vector<2x128xf32> to vector<2xf32>
    %117 = vector.shape_cast %116 : vector<2xf32> to vector<2x1xf32>
    %118 = tpu.reciprocal %117 {approx = true} : vector<2x1xf32> -> vector<2x1xf32>
    %119 = vector.broadcast %118 : vector<2x1xf32> to vector<2x128xf32>
    %120 = arith.mulf %115, %119 : vector<2x128xf32>
    %121 = arith.truncf %107 : vector<2x32xf32> to vector<2x32xbf16>
    %cst_49 = arith.constant dense<0.000000e+00> : vector<2x128xf32>
    %122 = tpu.matmul %121, %27, %cst_49 {dimension_numbers = #tpu.dot_dimension_numbers<[1], [0], [0], [1], [0, 0, 1, 1], [], []>} : vector<2x32xbf16>, vector<32x128xbf16>, vector<2x128xf32> -> vector<2x128xf32>
    %123 = arith.addf %122, %31 : vector<2x128xf32>
    %124 = vector.extract_strided_slice %123 {offsets = [0, 0], sizes = [2, 32], strides = [1, 1]} : vector<2x128xf32> to vector<2x32xf32>
    %125 = arith.negf %124 : vector<2x32xf32>
    %126 = math.exp %125 : vector<2x32xf32>
    %cst_50 = arith.constant 1.000000e+00 : f32
    %127 = vector.broadcast %cst_50 : f32 to vector<2x32xf32>
    %128 = arith.addf %127, %126 : vector<2x32xf32>
    %129 = arith.divf %127, %128 : vector<2x32xf32>
    %130 = vector.extract_strided_slice %123 {offsets = [0, 32], sizes = [2, 32], strides = [1, 1]} : vector<2x128xf32> to vector<2x32xf32>
    %131 = arith.negf %130 : vector<2x32xf32>
    %132 = math.exp %131 : vector<2x32xf32>
    %cst_51 = arith.constant 1.000000e+00 : f32
    %133 = vector.broadcast %cst_51 : f32 to vector<2x32xf32>
    %134 = arith.addf %133, %132 : vector<2x32xf32>
    %135 = arith.divf %133, %134 : vector<2x32xf32>
    %136 = vector.extract_strided_slice %123 {offsets = [0, 64], sizes = [2, 32], strides = [1, 1]} : vector<2x128xf32> to vector<2x32xf32>
    %137 = math.tanh %136 : vector<2x32xf32>
    %138 = vector.extract_strided_slice %123 {offsets = [0, 96], sizes = [2, 32], strides = [1, 1]} : vector<2x128xf32> to vector<2x32xf32>
    %139 = arith.negf %138 : vector<2x32xf32>
    %140 = math.exp %139 : vector<2x32xf32>
    %cst_52 = arith.constant 1.000000e+00 : f32
    %141 = vector.broadcast %cst_52 : f32 to vector<2x32xf32>
    %142 = arith.addf %141, %140 : vector<2x32xf32>
    %143 = arith.divf %141, %142 : vector<2x32xf32>
    %144 = arith.mulf %135, %105 : vector<2x32xf32>
    %145 = arith.mulf %129, %137 : vector<2x32xf32>
    %146 = arith.addf %144, %145 : vector<2x32xf32>
    %147 = math.tanh %146 : vector<2x32xf32>
    %148 = arith.mulf %143, %147 : vector<2x32xf32>
    %149 = arith.truncf %148 : vector<2x32xf32> to vector<2x32xbf16>
    %cst_53 = arith.constant dense<0.000000e+00> : vector<2x128xf32>
    %150 = tpu.matmul %149, %28, %cst_53 {dimension_numbers = #tpu.dot_dimension_numbers<[1], [0], [0], [1], [0, 0, 1, 1], [], []>} : vector<2x32xbf16>, vector<32x128xbf16>, vector<2x128xf32> -> vector<2x128xf32>
    %151 = arith.addf %150, %34 : vector<2x128xf32>
    %cst_54 = arith.constant dense<0xFF800000> : vector<2xf32>
    %152 = vector.multi_reduction <maximumf>, %151, %cst_54 [1] : vector<2x128xf32> to vector<2xf32>
    %153 = vector.shape_cast %152 : vector<2xf32> to vector<2x1xf32>
    %154 = vector.broadcast %153 : vector<2x1xf32> to vector<2x128xf32>
    %155 = arith.subf %151, %154 : vector<2x128xf32>
    %156 = math.exp %155 : vector<2x128xf32>
    %cst_55 = arith.constant dense<0.000000e+00> : vector<2xf32>
    %157 = vector.multi_reduction <add>, %156, %cst_55 [1] : vector<2x128xf32> to vector<2xf32>
    %158 = vector.shape_cast %157 : vector<2xf32> to vector<2x1xf32>
    %159 = tpu.reciprocal %158 {approx = true} : vector<2x1xf32> -> vector<2x1xf32>
    %160 = vector.broadcast %159 : vector<2x1xf32> to vector<2x128xf32>
    %161 = arith.mulf %156, %160 : vector<2x128xf32>
    %162 = arith.truncf %148 : vector<2x32xf32> to vector<2x32xbf16>
    %cst_56 = arith.constant dense<0.000000e+00> : vector<2x128xf32>
    %163 = tpu.matmul %162, %27, %cst_56 {dimension_numbers = #tpu.dot_dimension_numbers<[1], [0], [0], [1], [0, 0, 1, 1], [], []>} : vector<2x32xbf16>, vector<32x128xbf16>, vector<2x128xf32> -> vector<2x128xf32>
    %164 = arith.addf %163, %31 : vector<2x128xf32>
    %165 = vector.extract_strided_slice %164 {offsets = [0, 0], sizes = [2, 32], strides = [1, 1]} : vector<2x128xf32> to vector<2x32xf32>
    %166 = arith.negf %165 : vector<2x32xf32>
    %167 = math.exp %166 : vector<2x32xf32>
    %cst_57 = arith.constant 1.000000e+00 : f32
    %168 = vector.broadcast %cst_57 : f32 to vector<2x32xf32>
    %169 = arith.addf %168, %167 : vector<2x32xf32>
    %170 = arith.divf %168, %169 : vector<2x32xf32>
    %171 = vector.extract_strided_slice %164 {offsets = [0, 32], sizes = [2, 32], strides = [1, 1]} : vector<2x128xf32> to vector<2x32xf32>
    %172 = arith.negf %171 : vector<2x32xf32>
    %173 = math.exp %172 : vector<2x32xf32>
    %cst_58 = arith.constant 1.000000e+00 : f32
    %174 = vector.broadcast %cst_58 : f32 to vector<2x32xf32>
    %175 = arith.addf %174, %173 : vector<2x32xf32>
    %176 = arith.divf %174, %175 : vector<2x32xf32>
    %177 = vector.extract_strided_slice %164 {offsets = [0, 64], sizes = [2, 32], strides = [1, 1]} : vector<2x128xf32> to vector<2x32xf32>
    %178 = math.tanh %177 : vector<2x32xf32>
    %179 = vector.extract_strided_slice %164 {offsets = [0, 96], sizes = [2, 32], strides = [1, 1]} : vector<2x128xf32> to vector<2x32xf32>
    %180 = arith.negf %179 : vector<2x32xf32>
    %181 = math.exp %180 : vector<2x32xf32>
    %cst_59 = arith.constant 1.000000e+00 : f32
    %182 = vector.broadcast %cst_59 : f32 to vector<2x32xf32>
    %183 = arith.addf %182, %181 : vector<2x32xf32>
    %184 = arith.divf %182, %183 : vector<2x32xf32>
    %185 = arith.mulf %176, %146 : vector<2x32xf32>
    %186 = arith.mulf %170, %178 : vector<2x32xf32>
    %187 = arith.addf %185, %186 : vector<2x32xf32>
    %188 = math.tanh %187 : vector<2x32xf32>
    %189 = arith.mulf %184, %188 : vector<2x32xf32>
    %190 = arith.truncf %189 : vector<2x32xf32> to vector<2x32xbf16>
    %cst_60 = arith.constant dense<0.000000e+00> : vector<2x128xf32>
    %191 = tpu.matmul %190, %28, %cst_60 {dimension_numbers = #tpu.dot_dimension_numbers<[1], [0], [0], [1], [0, 0, 1, 1], [], []>} : vector<2x32xbf16>, vector<32x128xbf16>, vector<2x128xf32> -> vector<2x128xf32>
    %192 = arith.addf %191, %34 : vector<2x128xf32>
    %cst_61 = arith.constant dense<0xFF800000> : vector<2xf32>
    %193 = vector.multi_reduction <maximumf>, %192, %cst_61 [1] : vector<2x128xf32> to vector<2xf32>
    %194 = vector.shape_cast %193 : vector<2xf32> to vector<2x1xf32>
    %195 = vector.broadcast %194 : vector<2x1xf32> to vector<2x128xf32>
    %196 = arith.subf %192, %195 : vector<2x128xf32>
    %197 = math.exp %196 : vector<2x128xf32>
    %cst_62 = arith.constant dense<0.000000e+00> : vector<2xf32>
    %198 = vector.multi_reduction <add>, %197, %cst_62 [1] : vector<2x128xf32> to vector<2xf32>
    %199 = vector.shape_cast %198 : vector<2xf32> to vector<2x1xf32>
    %200 = tpu.reciprocal %199 {approx = true} : vector<2x1xf32> -> vector<2x1xf32>
    %201 = vector.broadcast %200 : vector<2x1xf32> to vector<2x128xf32>
    %202 = arith.mulf %197, %201 : vector<2x128xf32>
    %203 = vector.shape_cast %66 : vector<2x32xf32> to vector<2x1x32xf32>
    %204 = vector.shape_cast %107 : vector<2x32xf32> to vector<2x1x32xf32>
    %205 = vector.shape_cast %148 : vector<2x32xf32> to vector<2x1x32xf32>
    %206 = vector.shape_cast %189 : vector<2x32xf32> to vector<2x1x32xf32>
    %207 = tpu.concatenate %203, %204, %205, %206 in 1 : vector<2x1x32xf32>, vector<2x1x32xf32>, vector<2x1x32xf32>, vector<2x1x32xf32> -> vector<2x4x32xf32>
    %c0_63 = arith.constant 0 : index
    %c0_64 = arith.constant 0 : index
    %c0_65 = arith.constant 0 : index
    %208 = vector.load %arg14[%c0_63, %c0_64, %c0_65] : memref<2x4x32xf32, #tpu.memory_space<vmem>>, vector<2x4x32xf32>
    tpu.vector_store %arg14[%c0_63, %c0_64, %c0_65], %207 {strides = array<i32>} : memref<2x4x32xf32, #tpu.memory_space<vmem>>, vector<2x4x32xf32>,
    %209 = vector.shape_cast %79 : vector<2x128xf32> to vector<2x1x128xf32>
    %210 = vector.shape_cast %120 : vector<2x128xf32> to vector<2x1x128xf32>
    %211 = vector.shape_cast %161 : vector<2x128xf32> to vector<2x1x128xf32>
    %212 = vector.shape_cast %202 : vector<2x128xf32> to vector<2x1x128xf32>
    %213 = tpu.concatenate %209, %210, %211, %212 in 1 : vector<2x1x128xf32>, vector<2x1x128xf32>, vector<2x1x128xf32>, vector<2x1x128xf32> -> vector<2x4x128xf32>
    %c0_66 = arith.constant 0 : index
    %c0_67 = arith.constant 0 : index
    %c0_68 = arith.constant 0 : index
    %214 = vector.load %arg15[%c0_66, %c0_67, %c0_68] : memref<2x4x128xf32, #tpu.memory_space<vmem>>, vector<2x4x128xf32>
    tpu.vector_store %arg15[%c0_66, %c0_67, %c0_68], %213 {strides = array<i32>} : memref<2x4x128xf32, #tpu.memory_space<vmem>>, vector<2x4x128xf32>,
    return
  }
  func.func @transform_0(%arg0: i32) -> (i32, i32, i32) {
    %c0_i32 = arith.constant 0 : i32
    %c0_i32_0 = arith.constant 0 : i32
    %c0_i32_1 = arith.constant 0 : i32
    %c0_i32_2 = arith.constant 0 : i32
    return %c0_i32, %c0_i32_0, %c0_i32_1 : i32, i32, i32
  }
  func.func @transform_1(%arg0: i32) -> (i32, i32, i32) {
    %c0_i32 = arith.constant 0 : i32
    %c0_i32_0 = arith.constant 0 : i32
    %c0_i32_1 = arith.constant 0 : i32
    %c0_i32_2 = arith.constant 0 : i32
    return %c0_i32, %c0_i32_0, %c0_i32_1 : i32, i32, i32
  }
  func.func @transform_2(%arg0: i32) -> (i32, i32, i32) {
    %c0_i32 = arith.constant 0 : i32
    %c0_i32_0 = arith.constant 0 : i32
    %c0_i32_1 = arith.constant 0 : i32
    %c0_i32_2 = arith.constant 0 : i32
    return %c0_i32, %c0_i32_0, %c0_i32_1 : i32, i32, i32
  }
  func.func @transform_3(%arg0: i32) -> (i32, i32) {
    %c0_i32 = arith.constant 0 : i32
    %c0_i32_0 = arith.constant 0 : i32
    %c0_i32_1 = arith.constant 0 : i32
    return %c0_i32, %c0_i32_0 : i32, i32
  }
  func.func @transform_4(%arg0: i32) -> (i32, i32) {
    %c0_i32 = arith.constant 0 : i32
    %c0_i32_0 = arith.constant 0 : i32
    %c0_i32_1 = arith.constant 0 : i32
    return %c0_i32, %c0_i32_0 : i32, i32
  }
  func.func @transform_5(%arg0: i32) -> (i32, i32) {
    %c0_i32 = arith.constant 0 : i32
    %c0_i32_0 = arith.constant 0 : i32
    %c0_i32_1 = arith.constant 0 : i32
    return %c0_i32, %c0_i32_0 : i32, i32
  }
  func.func @transform_6(%arg0: i32) -> (i32, i32) {
    %c0_i32 = arith.constant 0 : i32
    %c0_i32_0 = arith.constant 0 : i32
    %c0_i32_1 = arith.constant 0 : i32
    return %c0_i32, %c0_i32_0 : i32, i32
  }
  func.func @transform_7(%arg0: i32) -> (i32, i32) {
    %c0_i32 = arith.constant 0 : i32
    %c0_i32_0 = arith.constant 0 : i32
    %c0_i32_1 = arith.constant 0 : i32
    return %c0_i32, %c0_i32_0 : i32, i32
  }
  func.func @transform_8(%arg0: i32) -> (i32, i32) {
    %c0_i32 = arith.constant 0 : i32
    %c0_i32_0 = arith.constant 0 : i32
    %c0_i32_1 = arith.constant 0 : i32
    return %c0_i32, %c0_i32_0 : i32, i32
  }
  func.func @transform_9(%arg0: i32) -> (i32, i32) {
    %c0_i32 = arith.constant 0 : i32
    %c0_i32_0 = arith.constant 0 : i32
    %c0_i32_1 = arith.constant 0 : i32
    return %c0_i32, %c0_i32_0 : i32, i32
  }
  func.func @transform_10(%arg0: i32) -> (i32, i32) {
    %c0_i32 = arith.constant 0 : i32
    %c0_i32_0 = arith.constant 0 : i32
    %c0_i32_1 = arith.constant 0 : i32
    return %c0_i32, %c0_i32_0 : i32, i32
  }
  func.func @transform_11(%arg0: i32) -> (i32, i32) {
    %c0_i32 = arith.constant 0 : i32
    %c0_i32_0 = arith.constant 0 : i32
    %c0_i32_1 = arith.constant 0 : i32
    return %c0_i32, %c0_i32_0 : i32, i32
  }
  func.func @transform_12(%arg0: i32) -> (i32, i32, i32) {
    %c0_i32 = arith.constant 0 : i32
    %c0_i32_0 = arith.constant 0 : i32
    %c0_i32_1 = arith.constant 0 : i32
    %c0_i32_2 = arith.constant 0 : i32
    return %c0_i32, %c0_i32_0, %c0_i32_1 : i32, i32, i32
  }
  func.func @transform_13(%arg0: i32) -> (i32, i32, i32) {
    %c0_i32 = arith.constant 0 : i32
    %c0_i32_0 = arith.constant 0 : i32
    %c0_i32_1 = arith.constant 0 : i32
    %c0_i32_2 = arith.constant 0 : i32
    return %c0_i32, %c0_i32_0, %c0_i32_1 : i32, i32, i32
  }
  func.func @transform_14(%arg0: i32) -> (i32, i32, i32) {
    %c0_i32 = arith.constant 0 : i32
    %c0_i32_0 = arith.constant 0 : i32
    %c0_i32_1 = arith.constant 0 : i32
    %c0_i32_2 = arith.constant 0 : i32
    return %c0_i32, %c0_i32_0, %c0_i32_1 : i32, i32, i32
  }
}

</mosaic_0001>

<bundles_post_ra>
// kernel: tpu_custom_call.1
= control target key start
LH: loop header
LB: loop body
LE: loop exit
PB: predicated region body
PF: predicated region fallthrough
CT: control target
= control target key end

     0   :  { %20 = vsyncpa [#allocation3], 0  ;;  %s2308_s0 = inlined_call_operand.hbm [shape: bf16[2,8,32], index: 0, kind: input, shape index: {}]   ;;  %s2309_s1 = inlined_call_operand.vmem [shape: bf16[2,32,8], index: 1, kind: input, shape index: {}]   ;;  %s2310_s2 = inlined_call_operand.hbm [shape: bf16[2,8,32], index: 2, kind: input, shape index: {}]   ;;  %s2311_s3 = inlined_call_operand.vmem [shape: f32[2,8], index: 3, kind: input, shape index: {}]   ;;  %s2312_s4 = inlined_call_operand.hbm [shape: f32[1,32], index: 4, kind: input, shape index: {}]   ;;  %s2313_s5 = inlined_call_operand.vmem [shape: bf16[32,128], index: 5, kind: input, shape index: {}]   ;;  %s2314_s6 = inlined_call_operand.vmem [shape: bf16[32,128], index: 6, kind: input, shape index: {}]   ;;  %s2315_s7 = inlined_call_operand.vmem [shape: bf16[32,128], index: 7, kind: input, shape index: {}]   ;;  %s2316_s8 = inlined_call_operand.vmem [shape: f32[1,128], index: 8, kind: input, shape index: {}]   ;;  %s2317_s9 = inlined_call_operand.vmem [shape: bf16[1,32], index: 9, kind: input, shape index: {}]   ;;  %s2318_s10 = inlined_call_operand.vmem [shape: bf16[32,128], index: 10, kind: input, shape index: {}]   ;;  %s2319_s11 = inlined_call_operand.vmem [shape: f32[1,128], index: 11, kind: input, shape index: {}]   ;;  %s2320_s12 = inlined_call_operand.hbm [shape: f32[2,8,8], index: 12, kind: output, shape index: {0}]   ;;  %s2321_s13 = inlined_call_operand.hbm [shape: f32[2,4,32], index: 13, kind: output, shape index: {1}]   ;;  %s2322_s14 = inlined_call_operand.hbm [shape: f32[2,4,128], index: 14, kind: output, shape index: {2}]  }
   0x1   :  { %21 = vsyncpa [#allocation6], 0 }
   0x2   :  { %22 = vsyncpa [#allocation4], 0 }
   0x3   :  { %23 = vsyncpa [#allocation10], 0  ;;  %s1868_s29 = smov [#allocation5]   ;;  %s1869_s15 = smov [#allocation2]  }
   0x4   :  { %s43_s30 = sshll.u32 %s1868_s29, 4  ;;  %s29_s16 = sshll.u32 %s1869_s15, 4  ;;  %s44_s30 = int_to_ptr.vmem [resolvable:$true] %s43_s30  ;;  %s1957_s16 = int_to_ptr.vmem [resolvable:$true] %s29_s16 }
   0x5   :  { %s1728_s19 = scalar_lea.hbm %s2310_s2, 128 }
   0x6   :  { %p1729_p0 = scmp.ne.s32.totalorder %s2310_s2, %s1728_s19  ;;  %p1732_p1 = scmp.lt.u32.totalorder %s1728_s19, %s2310_s2 }
   0x8   :  { %p1734_p2 = pnand %p1732_p1, %p1729_p0 }
   0xa   :  { %1737 = shalt.err (!%p1734_p2)
}
   0xb   :  { %s1738_s24 = scalar_lea.vmem %s44_s30, 128  ;;  %p1743_p4 = scmp.lt.s32.totalorder %s44_s30, %s44_s30 }
   0xc   :  { %p1739_p3 = scmp.ne.s32.totalorder %s44_s30, %s1738_s24  ;;  %p1744_p5 = scmp.lt.s32.totalorder %s1738_s24, %s1738_s24 }
   0xe   :  { %p1745_p6 = por %p1744_p5, %p1743_p4 }
  0x10   :  { %p1746_p7 = pnand %p1745_p6, %p1739_p3 }
  0x12   :  { %1749 = shalt.err (!%p1746_p7)
}
  0x13   :  { %s1870_s25 = smov 64   ;;  %s1871_s26 = smov 4  }
  0x14   :  { %49 = dma.hbm_to_vmem [thread:$0]  %s2310_s2, 128, %s44_s30, [#allocation6], %s1870_s25, %s1870_s25, %s1871_s26  }
  0x15   :  { %s1750_s17 = scalar_lea.hbm %s2308_s0, 128 }
  0x16   :  { %p1751_p8 = scmp.ne.s32.totalorder %s2308_s0, %s1750_s17  ;;  %p1754_p9 = scmp.lt.u32.totalorder %s1750_s17, %s2308_s0 }
  0x18   :  { %p1756_p10 = pnand %p1754_p9, %p1751_p8 }
  0x1a   :  { %1759 = shalt.err (!%p1756_p10)
}
  0x1b   :  { %s1760_s22 = scalar_lea.vmem %s1957_s16, 128  ;;  %p1765_p12 = scmp.lt.s32.totalorder %s1957_s16, %s1957_s16 }
  0x1c   :  { %p1761_p11 = scmp.ne.s32.totalorder %s1957_s16, %s1760_s22  ;;  %p1766_p13 = scmp.lt.s32.totalorder %s1760_s22, %s1760_s22 }
  0x1e   :  { %p1767_p0 = por %p1766_p13, %p1765_p12 }
  0x20   :  { %p1768_p1 = pnand %p1767_p0, %p1761_p11 }
  0x22   :  { %1771 = shalt.err (!%p1768_p1)
}
  0x23   :  { %35 = dma.hbm_to_vmem [thread:$0]  %s2308_s0, 128, %s1957_s16, [#allocation3], %s1870_s25, %s1870_s25, %s1871_s26  }
  0x24   :  { %s1872_s23 = smov [#allocation7]   ;;  %s1772_s29 = scalar_lea.hbm %s2312_s4, 16 }
  0x25   :  { %s58_s24 = sshll.u32 %s1872_s23, 4  ;;  %p1773_p2 = scmp.ne.s32.totalorder %s2312_s4, %s1772_s29  ;;  %s59_s24 = int_to_ptr.vmem [resolvable:$true] %s58_s24 }
  0x26   :  { %p1776_p3 = scmp.lt.u32.totalorder %s1772_s29, %s2312_s4 }
  0x28   :  { %p1778_p4 = pnand %p1776_p3, %p1773_p2 }
  0x2a   :  { %1781 = shalt.err (!%p1778_p4)
}
  0x2b   :  { %s1782_s20 = scalar_lea.vmem %s59_s24, 16  ;;  %s1786_s0 = scalar_lea.vmem %s59_s24, 32 }
  0x2c   :  { %p1783_p5 = scmp.ne.s32.totalorder %s59_s24, %s1782_s20  ;;  %p1787_p6 = scmp.lt.s32.totalorder %s59_s24, %s59_s24 }
  0x2d   :  { %p1788_p7 = scmp.lt.s32.totalorder %s1786_s0, %s1782_s20 }
  0x2f   :  { %p1789_p8 = por %p1788_p7, %p1787_p6 }
  0x31   :  { %p1790_p9 = pnand %p1789_p8, %p1783_p5 }
  0x33   :  { %1793 = shalt.err (!%p1790_p9)
}
  0x34   :  { %61 = dma.hbm_to_vmem [thread:$0]  %s2312_s4, 16, %s59_s24, [#allocation6]  }
  0x35   :  { %1860 = dma.done.wait [#allocation3], 128  }
  0x36   :  { %1861 = vsyncadd [#allocation3], 4294967168 }
  0x37   :  { %1862 = dma.done.wait [#allocation6], 144  }
  0x38   :  { %1863 = vsyncadd [#allocation6], 4294967152  ;;  %v1873_v0 = vmov 0.0   ;;  %vm1874_vm0 = vmmov 0   ;;  %v1660_v1 = vld [vmem:[%s2309_s1] sm:$0xff]   ;;  %v1661_v2 = vld [vmem:[%s2309_s1 + $0x8] sm:$0xff]   ;;  %v245_v29 = vlaneseq }
  0x39   :  { %1536 = vmatprep.subr.bf16.mxu0 %v1873_v0  ;;  %1544 = vmatprep.subr.bf16.mxu1 %v1873_v0  ;;  %v1662_v3 = vld [vmem:[%s2309_s1 + $0x10] sm:$0xff]   ;;  %v86_v4 = vld [vmem:[#allocation2] sm:$0xf]  ;;  %vm108_vm1 = vcmask 261120   ;;  %v1663_v5 = vld [vmem:[%s2309_s1 + $0x18] sm:$0xff]   ;;  %vm207_vm2 = vcmask 64512  }
  0x3a   :  { %1540 = vmatprep.mubr.msk.bf16.mxu0 %vm1874_vm0, %v1873_v0  ;;  %1548 = vmatprep.mubr.msk.bf16.mxu1 %vm1874_vm0, %v1873_v0  ;;  %v87_v6 = vld [vmem:[#allocation2 + $0x4] sm:$0xf]  ;;  %v1875_v27 = vmov 1966171168   ;;  %v2038_v32 = vshrl.u32 %v245_v29, 7  ;;  %vm407_vm3 = vcmask 1043456  }
  0x3b   :  { %1537 = vmatpush3.bf16.msra.mxu0 %v1660_v1  ;;  %1545 = vmatpush3.bf16.msra.mxu1 %v1662_v3  ;;  %v243_v28 = vunpack.c.l.s4 %v1875_v27  ;;  %v1466_v35 = vld.sshfl [vmem:[%s2311_s3] sm:$0x11 pattern:$0x75316420]  ;;  %v400_v43 = vld [vmem:[#allocation5] sm:$0xf] }
  0x3c   :  { %1538 = vmatprep.subr.bf16.mxu0 %v1873_v0  ;;  %1546 = vmatprep.subr.bf16.mxu1 %v1873_v0  ;;  %v241_v38 = vcombine.high %v1466_v35, %v1466_v35  ;;  %v409_v44 = vsel %vm407_vm3, %v400_v43, 0  ;;  %v401_v45 = vld [vmem:[#allocation5 + $0x4] sm:$0xf]  ;;  %v1664_v53 = vld [vmem:[%s2313_s5] sm:$0xff]   ;;  %v1471_v59 = vld [vmem:[#allocation7] ss:$0 sm:$0xff] }
  0x3d   :  { %v244_v31 = vunpack.c.0.s8 %v243_v28  ;;  %v455_v46 = vsel %vm407_vm3, %v401_v45, 0  ;;  %v1666_v54 = vld [vmem:[%s2313_s5 + $0x8] sm:$0xff]   ;;  %v1665_v55 = vld [vmem:[%s2314_s6] sm:$0xff]   ;;  %vm599_vm4 = vcmask 1041409   ;;  %vm1260_vm5 = vcmask 1040384  }
  0x3e   :  { %v536_v56 = vld [vmem:[%s2317_s9] sm:$0x1]  ;;  %v1667_v57 = vld [vmem:[%s2314_s6 + $0x8] sm:$0xff]   ;;  %vm746_vm6 = vcmask 1041408   ;;  %vm1265_vm7 = vcmask 1042432   ;;  %vm1276_vm8 = vcmask 257024  }
  0x3f   :  { %1539 = vmatpush3.bf16.msra.mxu0 %v1661_v2  ;;  %1547 = vmatpush3.bf16.msra.mxu1 %v1663_v5  ;;  %v2041_v34 = vsub.s32 %v244_v31, %v2038_v32 }
  0x40   :  { %1562 = vmatprep.subr.bf16.mxu0 %v1873_v0  ;;  %1552 = vmatprep.subr.mxu1 %v1873_v0 }
  0x41   :  { %v248_v37 = vrot.slane %v1466_v35, %v2041_v34  ;;  %v255_v41 = vrot.slane %v241_v38, %v2041_v34  ;;  %v2111_v38 = vld [vmem:[%s2315_s7] sm:$0xff]  }
  0x42   :  { %1541 = vmatmul.mubr.msk.bf16.vlgmr.msra.gmra.mrb[0].mxu0 %vm108_vm1, %v86_v4  ;;  %1549 = vmatmul.mubr.msk.bf16.vlgmr.msra.gmra.mrb[0].mxu1 %vm108_vm1, %v87_v6 }
  0x43   :  { %1564 = vmatprep.mubr.msk.bf16.mxu0 %vm1874_vm0, %v1873_v0  ;;  %1554 = vmatprep.mubr.msk.f32.mxu1 %vm1874_vm0, %v1873_v0 }
  0x44   :  { %1563 = vmatpush3.bf16.msra.mxu0 %v409_v44 }
  0x45   :  { %1574 = vmatprep.subr.bf16.mxu0 %v1873_v0 }
 0x115   :  { %v146_v7 = vpop.f32.mrb[0].mxu0  ;;  %v201_v11 = vpop.f32.mrb[0].mxu1 }
 0x116   :  { %v1542_v8 = vpop.f32.mrb[1].mxu0  ;;  %v208_v9 = vsel %vm207_vm2, %v146_v7, -inf  ;;  %v1550_v13 = vpop.f32.mrb[1].mxu1  ;;  %v211_v14 = vsel %vm207_vm2, %v201_v11, -inf }
 0x117   :  { %209 = vmax.xlane.f32.xlu0 %v208_v9  ;;  %v149_v10 = vpop.f32.mrb[2].mxu0  ;;  %v204_v15 = vpop.f32.mrb[2].mxu1 }
 0x118   :  { %v1543_v12 = vpop.f32.mrb[3].mxu0  ;;  %v1551_v16 = vpop.f32.mrb[3].mxu1 }
 0x11b   :  { %212 = vmax.xlane.f32.xlu0 %v211_v14 }
 0x1a4   :  { %v210_v17 = vpop.xlane.xlu0 %209 }
 0x1a5   :  { %v214_v18 = vsub.f32 %v146_v7, %v210_v17  ;;  %v2092_v17 = vsub.s32 0, %v2038_v32 }
 0x1a7   :  { %v216_v19 = vmul.f32 1.442695, %v214_v18 }
 0x1a8   :  { %v213_v20 = vpop.xlane.xlu0 %212 }
 0x1a9   :  { %1672 = vpow2.f32 %v216_v19  ;;  %v215_v21 = vsub.f32 %v201_v11, %v213_v20  ;;  %v2098_v19 = vld [vmem:[%s2316_s8] ss:$0 sm:$0xff]  ;;  %s1876_s8 = smov 32  }
 0x1ab   :  { %v218_v22 = vmul.f32 1.442695, %v215_v21 }
 0x1ad   :  { %1674 = vpow2.f32 %v218_v22 }
 0x1b3   :  { %v1673_v23 = vpop.eup %1672 }
 0x1b4   :  { %v220_v24 = vsel %vm207_vm2, %v1673_v23, 0.0 }
 0x1b5   :  { %221 = vadd.xlane.f32.xlu1 %v220_v24 }
 0x1b7   :  { %v1675_v25 = vpop.eup %1674 }
 0x1b8   :  { %v223_v26 = vsel %vm207_vm2, %v1675_v25, 0.0 }
 0x1b9   :  { %224 = vadd.xlane.f32.xlu1 %v223_v26 }
 0x242   :  { %v222_v30 = vpop.xlane.xlu1 %221 }
 0x243   :  { %1676 = vrcp.f32 %v222_v30 }
 0x246   :  { %v225_v33 = vpop.xlane.xlu1 %224 }
 0x247   :  { %1678 = vrcp.f32 %v225_v33 }
 0x24d   :  { %v1677_v36 = vpop.eup %1676 }
 0x24e   :  { %v228_v39 = vmul.f32 %v1677_v36, %v1673_v23 }
 0x250   :  { %1553 = vmatpush3.msra.mxu1 %v228_v39  ;;  %230 = vst.msk [vmem:[#allocation8] sm:$0xff] %vm207_vm2, %v228_v39  ;;  %v2118_v39 = vld [vmem:[%s2318_s10 + $0x8] sm:$0xff]  }
 0x251   :  { %v1679_v40 = vpop.eup %1678  ;;  %1555 = vmatmul.mubr.msk.f32.vlgmr.msra.gmra.mrb[4].mxu1 %vm207_vm2, %v248_v37  ;;  %1557 = vmatprep.subr.mxu1 %v1873_v0  ;;  %v2106_v37 = vld [vmem:[%s2318_s10] sm:$0xff]  }
 0x252   :  { %v229_v42 = vmul.f32 %v1679_v40, %v1675_v25  ;;  %1559 = vmatprep.mubr.msk.f32.mxu1 %vm1874_vm0, %v1873_v0  ;;  %v2123_v40 = vld [vmem:[%s2315_s7 + $0x8] sm:$0xff]  }
 0x254   :  { %1558 = vmatpush3.msra.mxu1 %v229_v42  ;;  %231 = vst.msk [vmem:[#allocation8 + $0x8] sm:$0xff] %vm207_vm2, %v229_v42 }
 0x255   :  { %1560 = vmatmul.mubr.msk.f32.vlgmr.msra.gmra.mrb[6].mxu1 %vm207_vm2, %v255_v41  ;;  %1568 = vmatprep.subr.bf16.mxu1 %v1873_v0 }
 0x256   :  { %1570 = vmatprep.mubr.msk.bf16.mxu1 %vm1874_vm0, %v1873_v0  ;;  %1569 = vmatpush3.bf16.msra.mxu1 %v455_v46 }
 0x257   :  { %1582 = vmatprep.subr.bf16.mxu1 %v1873_v0 }
 0x324   :  { %v324_v47 = vpop.f32.mrb[4].mxu1 }
 0x325   :  { %v402_v48 = vpack.c.bf16 %v324_v47, %v324_v47  ;;  %v1556_v49 = vpop.f32.mrb[5].mxu1 }
 0x327   :  { %1565 = vmatmul.mubr.msk.bf16.vlgmr.msra.gmra.mrb[4].mxu0 %vm207_vm2, %v402_v48 }
 0x328   :  { %v396_v50 = vpop.f32.mrb[6].mxu1  ;;  %1578 = vmatprep.mubr.msk.bf16.mxu0 %vm1874_vm0, %v1873_v0  ;;  %1575 = vmatpush3.bf16.msra.mxu0 %v1664_v53 }
 0x329   :  { %v403_v51 = vpack.c.bf16 %v396_v50, %v396_v50  ;;  %v1561_v52 = vpop.f32.mrb[7].mxu1  ;;  %1576 = vmatprep.subr.bf16.mxu0 %v1873_v0 }
 0x32b   :  { %1571 = vmatmul.mubr.msk.bf16.vlgmr.msra.gmra.mrb[8].mxu1 %vm207_vm2, %v403_v51 }
 0x32c   :  { %1586 = vmatprep.mubr.msk.bf16.mxu1 %vm1874_vm0, %v1873_v0  ;;  %1577 = vmatpush3.bf16.msra.mxu0 %v1666_v54 }
 0x32d   :  { %1583 = vmatpush3.bf16.msra.mxu1 %v1665_v55  ;;  %1590 = vmatprep.subr.bf16.mxu0 %v1873_v0 }
 0x32e   :  { %1584 = vmatprep.subr.bf16.mxu1 %v1873_v0 }
 0x32f   :  { %1579 = vmatmul.mubr.msk.bf16.vlgmr.msra.gmra.mrb[8].mxu0 %vm108_vm1, %v536_v56 }
 0x330   :  { %1594 = vmatprep.mubr.msk.bf16.mxu0 %vm1874_vm0, %v1873_v0  ;;  %1591 = vmatpush3.bf16.msra.mxu0 %v2106_v37 }
 0x331   :  { %1585 = vmatpush3.bf16.msra.mxu1 %v1667_v57  ;;  %1592 = vmatprep.subr.bf16.mxu0 %v1873_v0 }
 0x332   :  { %1598 = vmatprep.subr.bf16.mxu1 %v1873_v0 }
 0x334   :  { %1593 = vmatpush3.bf16.msra.mxu0 %v2118_v39 }
 0x335   :  { %1606 = vmatprep.subr.bf16.mxu0 %v1873_v0 }
 0x3fa   :  { %v445_v58 = vpop.f32.mrb[4].mxu0 }
 0x3fb   :  { %v1566_v60 = vpop.f32.mrb[5].mxu0  ;;  %v504_v62 = vadd.f32 %v1471_v59, %v445_v58 }
 0x3fc   :  { %v448_v61 = vpop.f32.mrb[6].mxu0 }
 0x3fd   :  { %v1567_v63 = vpop.f32.mrb[7].mxu0  ;;  %v592_v5 = vpack.c.bf16 %v504_v62, %v504_v62 }
 0x3fe   :  { %v491_v1 = vpop.f32.mrb[8].mxu1 }
 0x3ff   :  { %v505_v2 = vadd.f32 %v1471_v59, %v491_v1  ;;  %v1572_v3 = vpop.f32.mrb[9].mxu1  ;;  %v596_v9 = vunpack.c.l.b16 %v592_v5 }
 0x400   :  { %v494_v4 = vpop.f32.mrb[10].mxu1 }
 0x401   :  { %v593_v6 = vpack.c.bf16 %v505_v2, %v505_v2  ;;  %v1573_v7 = vpop.f32.mrb[11].mxu1 }
 0x402   :  { %v586_v13 = vpop.f32.mrb[8].mxu0 }
 0x403   :  { %v597_v8 = vunpack.c.l.b16 %v593_v6  ;;  %v1580_v14 = vpop.f32.mrb[9].mxu0  ;;  %v660_v18 = vrot.slane %v586_v13, %v2092_v17 }
 0x404   :  { %v589_v15 = vpop.f32.mrb[10].mxu0 }
 0x405   :  { %v598_v10 = vrot.slane %v597_v8, 7  ;;  %v1581_v16 = vpop.f32.mrb[11].mxu0 }
 0x407   :  { %v600_v11 = vsel %vm599_vm4, %v598_v10, %v596_v9 }
 0x408   :  { %v601_v12 = vpack.c.b16 %v600_v11, %v600_v11 }
 0x40a   :  { %1587 = vmatmul.mubr.msk.bf16.vlgmr.msra.gmra.mrb[12].mxu1 %vm108_vm1, %v601_v12 }
 0x40b   :  { %1602 = vmatprep.mubr.msk.bf16.mxu1 %vm1874_vm0, %v1873_v0  ;;  %1599 = vmatpush3.bf16.msra.mxu1 %v2111_v38 }
 0x40c   :  { %1600 = vmatprep.subr.bf16.mxu1 %v1873_v0 }
 0x40f   :  { %1601 = vmatpush3.bf16.msra.mxu1 %v2123_v40 }
 0x410   :  { %1614 = vmatprep.subr.bf16.mxu1 %v1873_v0 }
 0x4dd   :  { %v651_v20 = vpop.f32.mrb[12].mxu1 }
 0x4de   :  { %v661_v21 = vadd.f32 %v660_v18, %v651_v20  ;;  %v1588_v22 = vpop.f32.mrb[13].mxu1 }
 0x4df   :  { %v654_v23 = vpop.f32.mrb[14].mxu1 }
 0x4e0   :  { %v662_v24 = vadd.f32 %v2098_v19, %v661_v21  ;;  %v1589_v25 = vpop.f32.mrb[15].mxu1 }
 0x4e2   :  { %1680 = vtanh.f32 %v662_v24  ;;  %v1480_v27 = vmul.f32 -1.442695, %v662_v24 }
 0x4e4   :  { %1682 = vpow2.f32 %v1480_v27 }
 0x4ec   :  { %v1681_v26 = vpop.eup %1680 }
 0x4ed   :  { %672 = vrot.lane.b32.xlu0 %v1681_v26, %s1870_s25 }
 0x4ee   :  { %v1683_v28 = vpop.eup %1682 }
 0x4ef   :  { %v666_v29 = vadd.f32 1.0, %v1683_v28 }
 0x4f1   :  { %1684 = vrcp.f32 %v666_v29 }
 0x4fb   :  { %v1685_v30 = vpop.eup %1684 }
 0x4fc   :  { %v670_v33 = vmul.f32 0.0, %v1685_v30 }
 0x55f   :  { %v673_v31 = vpop.permute.xlu0 %672 }
 0x560   :  { %v675_v32 = vmul.f32 %v1685_v30, %v673_v31 }
 0x562   :  { %677 = vrot.lane.b32.xlu1 %v675_v32, %s1876_s8 }
 0x5d4   :  { %v678_v35 = vpop.permute.xlu1 %677 }
 0x5d5   :  { %v680_v36 = vadd.f32 %v678_v35, %v670_v33 }
 0x5d7   :  { %1686 = vtanh.f32 %v680_v36 }
 0x5e1   :  { %v1687_v41 = vpop.eup %1686 }
 0x5e2   :  { %683 = vrot.lane.b32.xlu1 %v1687_v41, %s1870_s25 }
 0x654   :  { %v684_v42 = vpop.permute.xlu1 %683 }
 0x655   :  { %v686_v43 = vmul.f32 %v1685_v30, %v684_v42 }
 0x657   :  { %v687_v44 = vpack.c.bf16 %v686_v43, %v686_v43  ;;  %v1143_v4 = vrot.slane %v686_v43, %v2041_v34 }
 0x659   :  { %689 = vrot.lane.b32.xlu1 %v687_v44, %s1876_s8  ;;  %v1144_v8 = vcombine.high %v1143_v4, %v1143_v4  ;;  %v1151_v11 = vrot.slane %v1143_v4, %v2041_v34 }
 0x65b   :  { %v1158_v14 = vrot.slane %v1144_v8, %v2041_v34 }
 0x6cb   :  { %v690_v45 = vpop.permute.xlu1 %689 }
 0x6cc   :  { %1595 = vmatmul.mubr.msk.bf16.vlgmr.msra.gmra.mrb[12].mxu0 %vm108_vm1, %v690_v45  ;;  %1603 = vmatmul.mubr.msk.bf16.vlgmr.msra.gmra.mrb[16].mxu1 %vm108_vm1, %v690_v45 }
 0x6cd   :  { %1607 = vmatpush3.bf16.msra.mxu0 %v2106_v37  ;;  %1615 = vmatpush3.bf16.msra.mxu1 %v2111_v38 }
 0x6ce   :  { %1608 = vmatprep.subr.bf16.mxu0 %v1873_v0  ;;  %1616 = vmatprep.subr.bf16.mxu1 %v1873_v0 }
 0x6cf   :  { %1618 = vmatprep.mubr.msk.bf16.mxu1 %vm1874_vm0, %v1873_v0  ;;  %1610 = vmatprep.mubr.msk.bf16.mxu0 %vm1874_vm0, %v1873_v0 }
 0x6d1   :  { %1609 = vmatpush3.bf16.msra.mxu0 %v2118_v39  ;;  %1617 = vmatpush3.bf16.msra.mxu1 %v2123_v40 }
 0x6d2   :  { %1622 = vmatprep.subr.bf16.mxu0 %v1873_v0  ;;  %1630 = vmatprep.subr.bf16.mxu1 %v1873_v0 }
 0x79f   :  { %v2147_v46 = vpop.f32.mrb[12].mxu0  ;;  %v804_v47 = vpop.f32.mrb[16].mxu1 }
 0x7a0   :  { %v805_v48 = vadd.f32 %v2098_v19, %v804_v47  ;;  %v1596_v49 = vpop.f32.mrb[13].mxu0  ;;  %v1604_v50 = vpop.f32.mrb[17].mxu1 }
 0x7a1   :  { %v743_v51 = vpop.f32.mrb[14].mxu0  ;;  %v807_v52 = vpop.f32.mrb[18].mxu1 }
 0x7a2   :  { %1688 = vtanh.f32 %v805_v48  ;;  %v1597_v53 = vpop.f32.mrb[15].mxu0  ;;  %v1605_v54 = vpop.f32.mrb[19].mxu1  ;;  %v1487_v56 = vmul.f32 -1.442695, %v805_v48 }
 0x7a4   :  { %1690 = vpow2.f32 %v1487_v56 }
 0x7ac   :  { %v1689_v55 = vpop.eup %1688 }
 0x7ad   :  { %819 = vrot.lane.b32.xlu0 %v1689_v55, %s1870_s25 }
 0x7ae   :  { %v1691_v57 = vpop.eup %1690 }
 0x7af   :  { %v813_v58 = vadd.f32 1.0, %v1691_v57 }
 0x7b1   :  { %1692 = vrcp.f32 %v813_v58 }
 0x7bb   :  { %v1693_v59 = vpop.eup %1692 }
 0x7bc   :  { %v817_v62 = vmul.f32 %v1693_v59, %v680_v36 }
 0x81f   :  { %v820_v60 = vpop.permute.xlu0 %819 }
 0x820   :  { %v822_v61 = vmul.f32 %v1693_v59, %v820_v60 }
 0x822   :  { %824 = vrot.lane.b32.xlu1 %v822_v61, %s1876_s8 }
 0x894   :  { %v825_v63 = vpop.permute.xlu1 %824 }
 0x895   :  { %v827_v1 = vadd.f32 %v825_v63, %v817_v62 }
 0x897   :  { %1694 = vtanh.f32 %v827_v1 }
 0x8a1   :  { %v1695_v2 = vpop.eup %1694 }
 0x8a2   :  { %830 = vrot.lane.b32.xlu0 %v1695_v2, %s1870_s25 }
 0x914   :  { %v831_v3 = vpop.permute.xlu0 %830 }
 0x915   :  { %v833_v5 = vmul.f32 %v1693_v59, %v831_v3 }
 0x917   :  { %v834_v6 = vpack.c.bf16 %v833_v5, %v833_v5  ;;  %v1168_v7 = vrot.slane %v833_v5, %v2041_v34 }
 0x919   :  { %v1169_v9 = vcombine.high %v1168_v7, %v1168_v7  ;;  %v1176_v10 = vrot.slane %v1168_v7, %v2041_v34  ;;  %836 = vrot.lane.b32.xlu1 %v834_v6, %s1876_s8 }
 0x91b   :  { %v1183_v12 = vrot.slane %v1169_v9, %v2041_v34  ;;  %v1233_v13 = vrot.slane %v1176_v10, %v2092_v17  ;;  %v1473_v10 = vld [vmem:[%s2319_s11] ss:$0 sm:$0xff]  ;;  %s1877_s11 = smov [#allocation8]  }
 0x91c   :  { %s1416_s1 = sshll.u32 %s1877_s11, 4  ;;  %s1417_s1 = int_to_ptr.vmem [resolvable:$true] %s1416_s1 }
 0x91d   :  { %v1237_v15 = vrot.slane %v1183_v12, %v2092_v17  ;;  %v1261_v16 = vsel %vm1260_vm5, %v1151_v11, %v1233_v13  ;;  %v741_v12 = vadd.f32 %v1473_v10, %v2147_v46  ;;  %s1794_s29 = scalar_lea.vmem %s1417_s1, 256  ;;  %p1799_p11 = scmp.lt.s32.totalorder %s1417_s1, %s1417_s1 }
 0x91e   :  { %p1795_p10 = scmp.ne.s32.totalorder %s1417_s1, %s1794_s29  ;;  %p1800_p12 = scmp.lt.s32.totalorder %s1794_s29, %s1794_s29 }
 0x91f   :  { %v1262_v18 = vsel %vm1260_vm5, %v1158_v14, %v1237_v15  ;;  %v747_v14 = vsel %vm746_vm6, %v741_v12, -inf }
 0x920   :  { %p1801_p13 = por %p1800_p12, %p1799_p11 }
 0x922   :  { %p1802_p0 = pnand %p1801_p13, %p1795_p10 }
 0x98b   :  { %v837_v20 = vpop.permute.xlu1 %836 }
 0x98c   :  { %1611 = vmatmul.mubr.msk.bf16.vlgmr.msra.gmra.mrb[16].mxu0 %vm108_vm1, %v837_v20  ;;  %1619 = vmatmul.mubr.msk.bf16.vlgmr.msra.gmra.mrb[20].mxu1 %vm108_vm1, %v837_v20 }
 0x98d   :  { %1623 = vmatpush3.bf16.msra.mxu0 %v2106_v37  ;;  %1631 = vmatpush3.bf16.msra.mxu1 %v2111_v38 }
 0x98e   :  { %1624 = vmatprep.subr.bf16.mxu0 %v1873_v0  ;;  %1632 = vmatprep.subr.bf16.mxu1 %v1873_v0 }
 0x98f   :  { %1634 = vmatprep.mubr.msk.bf16.mxu1 %vm1874_vm0, %v1873_v0  ;;  %1626 = vmatprep.mubr.msk.bf16.mxu0 %vm1874_vm0, %v1873_v0 }
 0x991   :  { %1625 = vmatpush3.bf16.msra.mxu0 %v2118_v39  ;;  %1633 = vmatpush3.bf16.msra.mxu1 %v2123_v40 }
 0x992   :  { %1638 = vmatprep.subr.bf16.mxu0 %v1873_v0 }
 0xa5f   :  { %v2177_v21 = vpop.f32.mrb[16].mxu0  ;;  %v926_v22 = vpop.f32.mrb[20].mxu1 }
 0xa60   :  { %v927_v23 = vadd.f32 %v2098_v19, %v926_v22  ;;  %v1612_v24 = vpop.f32.mrb[17].mxu0  ;;  %v1620_v25 = vpop.f32.mrb[21].mxu1  ;;  %v876_v11 = vadd.f32 %v1473_v10, %v2177_v21 }
 0xa61   :  { %v878_v26 = vpop.f32.mrb[18].mxu0  ;;  %v929_v27 = vpop.f32.mrb[22].mxu1 }
 0xa62   :  { %1696 = vtanh.f32 %v927_v23  ;;  %v1613_v28 = vpop.f32.mrb[19].mxu0  ;;  %v1621_v29 = vpop.f32.mrb[23].mxu1  ;;  %v1490_v31 = vmul.f32 -1.442695, %v927_v23  ;;  %v881_v13 = vsel %vm746_vm6, %v876_v11, -inf }
 0xa64   :  { %1698 = vpow2.f32 %v1490_v31 }
 0xa6c   :  { %v1697_v30 = vpop.eup %1696 }
 0xa6d   :  { %941 = vrot.lane.b32.xlu0 %v1697_v30, %s1870_s25 }
 0xa6e   :  { %v1699_v32 = vpop.eup %1698 }
 0xa6f   :  { %v935_v33 = vadd.f32 1.0, %v1699_v32 }
 0xa71   :  { %1700 = vrcp.f32 %v935_v33 }
 0xa7b   :  { %v1701_v35 = vpop.eup %1700 }
 0xa7c   :  { %v939_v40 = vmul.f32 %v1701_v35, %v827_v1 }
 0xadf   :  { %v942_v36 = vpop.permute.xlu0 %941 }
 0xae0   :  { %v944_v38 = vmul.f32 %v1701_v35, %v942_v36 }
 0xae2   :  { %946 = vrot.lane.b32.xlu1 %v944_v38, %s1876_s8 }
 0xb54   :  { %v947_v41 = vpop.permute.xlu1 %946 }
 0xb55   :  { %v949_v42 = vadd.f32 %v947_v41, %v939_v40 }
 0xb57   :  { %1702 = vtanh.f32 %v949_v42 }
 0xb61   :  { %v1703_v43 = vpop.eup %1702 }
 0xb62   :  { %952 = vrot.lane.b32.xlu0 %v1703_v43, %s1870_s25 }
 0xbd4   :  { %v953_v44 = vpop.permute.xlu0 %952 }
 0xbd5   :  { %v955_v45 = vmul.f32 %v1701_v35, %v953_v44 }
 0xbd7   :  { %v956_v47 = vpack.c.bf16 %v955_v45, %v955_v45  ;;  %v1191_v48 = vrot.slane %v955_v45, %v2041_v34 }
 0xbd9   :  { %v1192_v49 = vcombine.high %v1191_v48, %v1191_v48  ;;  %v1199_v50 = vrot.slane %v1191_v48, %v2041_v34  ;;  %958 = vrot.lane.b32.xlu1 %v956_v47, %s1876_s8 }
 0xbdb   :  { %v1206_v51 = vrot.slane %v1192_v49, %v2041_v34  ;;  %v1243_v52 = vrot.slane %v1199_v50, %v2092_v17 }
 0xbdd   :  { %v1263_v53 = vsel %vm746_vm6, %v1261_v16, %v1243_v52  ;;  %v1247_v54 = vrot.slane %v1206_v51, %v2092_v17 }
 0xbdf   :  { %v1264_v55 = vsel %vm746_vm6, %v1262_v18, %v1247_v54 }
 0xc4b   :  { %v959_v56 = vpop.permute.xlu1 %958 }
 0xc4c   :  { %1627 = vmatmul.mubr.msk.bf16.vlgmr.msra.gmra.mrb[20].mxu0 %vm108_vm1, %v959_v56  ;;  %1635 = vmatmul.mubr.msk.bf16.vlgmr.msra.gmra.mrb[24].mxu1 %vm108_vm1, %v959_v56 }
 0xc4d   :  { %1639 = vmatpush3.bf16.msra.mxu0 %v2106_v37  ;;  %1642 = vmatprep.mubr.msk.bf16.mxu0 %vm1874_vm0, %v1873_v0 }
 0xc4e   :  { %1640 = vmatprep.subr.bf16.mxu0 %v1873_v0 }
 0xc51   :  { %1641 = vmatpush3.bf16.msra.mxu0 %v2118_v39 }
 0xd1f   :  { %v997_v57 = vpop.f32.mrb[20].mxu0  ;;  %v1048_v58 = vpop.f32.mrb[24].mxu1 }
 0xd20   :  { %v1049_v59 = vadd.f32 %v2098_v19, %v1048_v58  ;;  %v1628_v60 = vpop.f32.mrb[21].mxu0  ;;  %v1636_v61 = vpop.f32.mrb[25].mxu1  ;;  %v998_v27 = vadd.f32 %v1473_v10, %v997_v57 }
 0xd21   :  { %v1000_v62 = vpop.f32.mrb[22].mxu0  ;;  %v1051_v63 = vpop.f32.mrb[26].mxu1 }
 0xd22   :  { %1704 = vtanh.f32 %v1049_v59  ;;  %v1629_v1 = vpop.f32.mrb[23].mxu0  ;;  %v1637_v2 = vpop.f32.mrb[27].mxu1  ;;  %v1493_v37 = vmul.f32 -1.442695, %v1049_v59  ;;  %v1003_v28 = vsel %vm746_vm6, %v998_v27, -inf }
 0xd24   :  { %1706 = vpow2.f32 %v1493_v37 }
 0xd2c   :  { %v1705_v3 = vpop.eup %1704 }
 0xd2d   :  { %1063 = vrot.lane.b32.xlu0 %v1705_v3, %s1870_s25 }
 0xd2e   :  { %v1707_v4 = vpop.eup %1706 }
 0xd2f   :  { %v1057_v0 = vadd.f32 1.0, %v1707_v4 }
 0xd31   :  { %1708 = vrcp.f32 %v1057_v0 }
 0xd3b   :  { %v1709_v39 = vpop.eup %1708 }
 0xd3c   :  { %v1061_v19 = vmul.f32 %v1709_v39, %v949_v42 }
 0xd9f   :  { %v1064_v5 = vpop.permute.xlu0 %1063 }
 0xda0   :  { %v1066_v6 = vmul.f32 %v1709_v39, %v1064_v5 }
 0xda2   :  { %1068 = vrot.lane.b32.xlu1 %v1066_v6, %s1876_s8 }
 0xe14   :  { %v1069_v7 = vpop.permute.xlu1 %1068 }
 0xe15   :  { %v1071_v8 = vadd.f32 %v1069_v7, %v1061_v19 }
 0xe17   :  { %1710 = vtanh.f32 %v1071_v8 }
 0xe21   :  { %v1711_v9 = vpop.eup %1710 }
 0xe22   :  { %1074 = vrot.lane.b32.xlu0 %v1711_v9, %s1870_s25 }
 0xe41   :  { %882 = vmax.xlane.f32.xlu0 %v881_v13 }
 0xe45   :  { %748 = vmax.xlane.f32.xlu0 %v747_v14 }
 0xe94   :  { %v1075_v15 = vpop.permute.xlu0 %1074 }
 0xe95   :  { %v1077_v16 = vmul.f32 %v1709_v39, %v1075_v15 }
 0xe97   :  { %v1078_v18 = vpack.c.bf16 %v1077_v16, %v1077_v16  ;;  %v1214_v20 = vrot.slane %v1077_v16, %v2041_v34 }
 0xe99   :  { %v1215_v22 = vcombine.high %v1214_v20, %v1214_v20  ;;  %v1222_v23 = vrot.slane %v1214_v20, %v2041_v34  ;;  %1080 = vrot.lane.b32.xlu1 %v1078_v18, %s1876_s8 }
 0xe9b   :  { %v1229_v21 = vrot.slane %v1215_v22, %v2041_v34  ;;  %v1253_v46 = vrot.slane %v1222_v23, %v2092_v17 }
 0xe9d   :  { %v1266_v24 = vsel %vm1265_vm7, %v1263_v53, %v1253_v46  ;;  %v1257_v25 = vrot.slane %v1229_v21, %v2092_v17 }
 0xe9f   :  { %v2217_v26 = vsel %vm1265_vm7, %v1264_v55, %v1257_v25 }
 0xebd   :  { %1004 = vmax.xlane.f32.xlu1 %v1003_v28 }
 0xece   :  { %v883_v36 = vpop.xlane.xlu0 %882 }
 0xecf   :  { %v884_v38 = vsub.f32 %v876_v11, %v883_v36 }
 0xed1   :  { %v885_v41 = vmul.f32 1.442695, %v884_v38 }
 0xed2   :  { %v749_v40 = vpop.xlane.xlu0 %748 }
 0xed3   :  { %v750_v42 = vsub.f32 %v741_v12, %v749_v40 }
 0xed5   :  { %v751_v43 = vmul.f32 1.442695, %v750_v42 }
 0xf0b   :  { %v1081_v29 = vpop.permute.xlu1 %1080 }
 0xf0c   :  { %1643 = vmatmul.mubr.msk.bf16.vlgmr.msra.gmra.mrb[24].mxu0 %vm108_vm1, %v1081_v29 }
 0xf4a   :  { %v1005_v30 = vpop.xlane.xlu1 %1004 }
 0xf4b   :  { %v1006_v31 = vsub.f32 %v998_v27, %v1005_v30 }
 0xf4d   :  { %v1007_v32 = vmul.f32 1.442695, %v1006_v31 }
 0xf4f   :  { %1712 = vpow2.f32 %v1007_v32 }
 0xf50   :  { %1714 = vpow2.f32 %v885_v41 }
 0xf51   :  { %1716 = vpow2.f32 %v751_v43 }
 0xf59   :  { %v2221_v33 = vpop.eup %1712 }
 0xf5a   :  { %v1009_v35 = vsel %vm746_vm6, %v2221_v33, 0.0  ;;  %v1715_v51 = vpop.eup %1714 }
 0xf5b   :  { %1010 = vadd.xlane.f32.xlu1 %v1009_v35  ;;  %v887_v52 = vsel %vm746_vm6, %v1715_v51, 0.0  ;;  %v1717_v53 = vpop.eup %1716 }
 0xf5c   :  { %v753_v54 = vsel %vm746_vm6, %v1717_v53, 0.0 }
 0xfdf   :  { %v1119_v44 = vpop.f32.mrb[24].mxu0 }
 0xfe0   :  { %v1120_v45 = vadd.f32 %v1473_v10, %v1119_v44  ;;  %v1644_v47 = vpop.f32.mrb[25].mxu0 }
 0xfe1   :  { %v1122_v48 = vpop.f32.mrb[26].mxu0 }
 0xfe2   :  { %v1645_v49 = vpop.f32.mrb[27].mxu0  ;;  %v1125_v50 = vsel %vm746_vm6, %v1120_v45, -inf }
 0xfe3   :  { %1126 = vmax.xlane.f32.xlu0 %v1125_v50 }
 0xfe7   :  { %888 = vadd.xlane.f32.xlu0 %v887_v52 }
 0xfeb   :  { %754 = vadd.xlane.f32.xlu0 %v753_v54 }
0x1001   :  { %1270 = vrot.lane.b32.xlu0 %v1266_v24, %s1876_s8 }
0x1070   :  { %v1127_v55 = vpop.xlane.xlu0 %1126 }
0x1071   :  { %v1128_v56 = vsub.f32 %v1120_v45, %v1127_v55 }
0x1073   :  { %v1129_v57 = vmul.f32 1.442695, %v1128_v56 }
0x1074   :  { %v889_v58 = vpop.xlane.xlu0 %888 }
0x1075   :  { %1718 = vpow2.f32 %v1129_v57 }
0x1076   :  { %1720 = vrcp.f32 %v889_v58 }
0x1078   :  { %v755_v59 = vpop.xlane.xlu0 %754 }
0x1079   :  { %1722 = vrcp.f32 %v755_v59 }
0x107c   :  { %v1271_v60 = vpop.permute.xlu0 %1270 }
0x107d   :  { %1277 = vst.msk [vmem:[#allocation9] sm:$0xf] %vm1276_vm8, %v1271_v60 }
0x107f   :  { %v2230_v61 = vpop.eup %1718 }
0x1080   :  { %v1721_v62 = vpop.eup %1720  ;;  %v1131_v63 = vsel %vm746_vm6, %v2230_v61, 0.0 }
0x1081   :  { %v891_v1 = vmul.f32 %v1721_v62, %v1715_v51  ;;  %1132 = vadd.xlane.f32.xlu1 %v1131_v63 }
0x1083   :  { %v1723_v2 = vpop.eup %1722  ;;  %v1311_v3 = vrot.slane %v891_v1, %v2041_v34 }
0x1084   :  { %v757_v37 = vmul.f32 %v1723_v2, %v1717_v53 }
0x1085   :  { %v1312_v4 = vcombine.high %v1311_v3, %v1311_v3  ;;  %v1319_v0 = vrot.slane %v1311_v3, %v2041_v34 }
0x1086   :  { %v1286_v39 = vrot.slane %v757_v37, %v2041_v34 }
0x1087   :  { %v1326_v5 = vrot.slane %v1312_v4, %v2041_v34  ;;  %v1376_v7 = vrot.slane %v1319_v0, %v2092_v17 }
0x1088   :  { %v1287_v6 = vcombine.high %v1286_v39, %v1286_v39  ;;  %v1294_v19 = vrot.slane %v1286_v39, %v2041_v34 }
0x1089   :  { %v1380_v9 = vrot.slane %v1326_v5, %v2092_v17 }
0x108a   :  { %v1301_v8 = vrot.slane %v1287_v6, %v2041_v34  ;;  %v1403_v10 = vsel %vm1260_vm5, %v1294_v19, %v1376_v7 }
0x108c   :  { %v2244_v11 = vsel %vm1260_vm5, %v1301_v8, %v1380_v9 }
0x1092   :  { %1272 = vrot.lane.b32.xlu1 %v2217_v26, %s1876_s8 }
0x1093   :  { %1805 = shalt.err (!%p1802_p0)
}
0x1094   :  { %s1806_s17 = scalar_lea.hbm %s2320_s12, 256 }
0x1095   :  { %p1807_p1 = scmp.ne.s32.totalorder %s2320_s12, %s1806_s17  ;;  %p1810_p2 = scmp.lt.u32.totalorder %s1806_s17, %s2320_s12 }
0x1097   :  { %p1812_p3 = pnand %p1810_p2, %p1807_p1 }
0x1099   :  { %1815 = shalt.err (!%p1812_p3)
}
0x109a   :  { %s1878_s16 = smov 128   ;;  %s1879_s21 = smov 8   ;;  %v1011_v12 = vpop.xlane.xlu1 %1010 }
0x109b   :  { %1422 = dma.vmem_to_hbm [thread:$0]  %s1417_s1, 256, %s2320_s12, [#allocation4], %s1878_s16, %s1878_s16, %s1879_s21   ;;  %1724 = vrcp.f32 %v1011_v12 }
0x109c   :  { %s1880_s6 = smov [#allocation9]  }
0x109d   :  { %s1428_s8 = sshll.u32 %s1880_s6, 4  ;;  %s1429_s8 = int_to_ptr.vmem [resolvable:$true] %s1428_s8 }
0x109e   :  { %s1816_s9 = scalar_lea.vmem %s1429_s8, 128  ;;  %p1821_p5 = scmp.lt.s32.totalorder %s1429_s8, %s1429_s8 }
0x109f   :  { %p1817_p4 = scmp.ne.s32.totalorder %s1429_s8, %s1816_s9  ;;  %p1822_p6 = scmp.lt.s32.totalorder %s1816_s9, %s1816_s9 }
0x10a1   :  { %p1823_p7 = por %p1822_p6, %p1821_p5 }
0x10a3   :  { %p1824_p8 = pnand %p1823_p7, %p1817_p4 }
0x10a5   :  { %v1725_v13 = vpop.eup %1724 }
0x10a6   :  { %v1013_v15 = vmul.f32 %v1725_v13, %v2221_v33 }
0x110e   :  { %v1133_v14 = vpop.xlane.xlu1 %1132 }
0x110f   :  { %1726 = vrcp.f32 %v1133_v14 }
0x1112   :  { %v1273_v16 = vpop.permute.xlu1 %1272 }
0x1113   :  { %1278 = vst.msk [vmem:[#allocation9 + $0x4] sm:$0xf] %vm1276_vm8, %v1273_v16 }
0x1114   :  { %1827 = shalt.err (!%p1824_p8)
}
0x1115   :  { %s1828_s4 = scalar_lea.hbm %s2321_s13, 128 }
0x1116   :  { %p1829_p9 = scmp.ne.s32.totalorder %s2321_s13, %s1828_s4  ;;  %p1832_p10 = scmp.lt.u32.totalorder %s1828_s4, %s2321_s13 }
0x1118   :  { %p1834_p11 = pnand %p1832_p10, %p1829_p9 }
0x111a   :  { %1837 = shalt.err (!%p1834_p11)
}
0x111b   :  { %1434 = dma.vmem_to_hbm [thread:$0]  %s1429_s8, 128, %s2321_s13, [#allocation10], %s1870_s25, %s1870_s25, %s1871_s26   ;;  %v1334_v18 = vrot.slane %v1013_v15, %v2041_v34  ;;  %v1727_v20 = vpop.eup %1726 }
0x111c   :  { %v1135_v23 = vmul.f32 %v1727_v20, %v2230_v61  ;;  %s1881_s13 = smov [#allocation11]  }
0x111d   :  { %v1335_v22 = vcombine.high %v1334_v18, %v1334_v18  ;;  %v1342_v21 = vrot.slane %v1334_v18, %v2041_v34  ;;  %s1440_s10 = sshll.u32 %s1881_s13, 4  ;;  %s1441_s10 = int_to_ptr.vmem [resolvable:$true] %s1440_s10 }
0x111e   :  { %v1357_v46 = vrot.slane %v1135_v23, %v2041_v34  ;;  %s1838_s11 = scalar_lea.vmem %s1441_s10, 128  ;;  %p1843_p13 = scmp.lt.s32.totalorder %s1441_s10, %s1441_s10 }
0x111f   :  { %v1349_v24 = vrot.slane %v1335_v22, %v2041_v34  ;;  %v1386_v27 = vrot.slane %v1342_v21, %v2092_v17  ;;  %p1839_p12 = scmp.ne.s32.totalorder %s1441_s10, %s1838_s11  ;;  %p1844_p0 = scmp.lt.s32.totalorder %s1838_s11, %s1838_s11 }
0x1120   :  { %v1358_v25 = vcombine.high %v1357_v46, %v1357_v46  ;;  %v1365_v26 = vrot.slane %v1357_v46, %v2041_v34 }
0x1121   :  { %v1390_v30 = vrot.slane %v1349_v24, %v2092_v17  ;;  %v1405_v31 = vsel %vm746_vm6, %v1403_v10, %v1386_v27  ;;  %p1845_p1 = por %p1844_p0, %p1843_p13 }
0x1122   :  { %v1372_v28 = vrot.slane %v1358_v25, %v2041_v34  ;;  %v1396_v29 = vrot.slane %v1365_v26, %v2092_v17 }
0x1123   :  { %v1406_v35 = vsel %vm746_vm6, %v2244_v11, %v1390_v30  ;;  %p1846_p2 = pnand %p1845_p1, %p1839_p12 }
0x1124   :  { %v1400_v32 = vrot.slane %v1372_v28, %v2092_v17  ;;  %v1407_v33 = vsel %vm1265_vm7, %v1405_v31, %v1396_v29 }
0x1125   :  { %1409 = vst [vmem:[#allocation11] sm:$0xf] %v1407_v33 }
0x1126   :  { %v1408_v36 = vsel %vm1265_vm7, %v1406_v35, %v1400_v32 }
0x1127   :  { %1410 = vst [vmem:[#allocation11 + $0x4] sm:$0xf] %v1408_v36 }
0x1128   :  { %1849 = shalt.err (!%p1846_p2)
}
0x1129   :  { %s1850_s3 = scalar_lea.hbm %s2322_s14, 128 }
0x112a   :  { %p1851_p3 = scmp.ne.s32.totalorder %s2322_s14, %s1850_s3  ;;  %p1854_p4 = scmp.lt.u32.totalorder %s1850_s3, %s2322_s14 }
0x112c   :  { %p1856_p5 = pnand %p1854_p4, %p1851_p3 }
0x112e   :  { %1859 = shalt.err (!%p1856_p5)
}
0x112f   :  { %1446 = dma.vmem_to_hbm [thread:$0]  %s1441_s10, 128, %s2322_s14, [#allocation10], %s1870_s25, %s1870_s25, %s1871_s26  }
0x1130   :  { %1864 = dma.done.wait [#allocation4], 256  }
0x1131   :  { %1865 = vsyncadd [#allocation4], 4294967040 }
0x1132   :  { %1866 = dma.done.wait [#allocation10], 256  }
0x1133   :  { %1867 = vsyncadd [#allocation10], 4294967040 }
0x1134   :  { %1456 = vsyncpa [#allocation3], 1 }
0x1135   :  { %1457 = vsyncpa [#allocation6], 1 }
0x1136   :  { %1458 = vsyncpa [#allocation4], 1 }
0x1137   :  { %1459 = vsyncpa [#allocation10], 1 }

</bundles_post_ra>
